<compile_context>
chip_gen: v7x
topology: tpu7x:2x2x1
jax: 0.10.0
libtpu: 0.0.40
codegen_flags: <defaults>
</compile_context>

<pallas_src>
import jax
import jax.numpy as jnp
from jax.experimental import pallas as pl
from jax.experimental.pallas import tpu as pltpu

# Hyperparameters mirroring the PyTorch module defaults.
INPUT_DIM = 8
TIME_DIM = 4
HIDDEN_DIM = 64
NUM_LAYERS = 2          # realised as two explicit LSTM layers inside the kernel
NUM_USERS = 10
EMBEDDING_DIM = 16
PRED_LEN = 5
FEAT_DIM = INPUT_DIM + TIME_DIM   # raw per-timestep features fed to the kernel


def _cdiv(a, b):
    return (a + b - 1) // b


def _rup(a, m):
    return _cdiv(a, m) * m


def _lstm_kernel(x_ref, ub_ref, wx_ref, ws_ref, wo_ref, bo_ref, out_ref, g_sc):
    T, Bt, F = x_ref.shape
    H2, G2 = ws_ref.shape           # (2H, 8H): stacked recurrent weight
    H = H2 // 2

    # ---- pre-loop (off the serial path): per-timestep additive gate term in the
    # interleaved layout [i0,i1,f0,f1,g0,g1,o0,o1].  Layer-0 columns carry the full
    # input contribution (value/time/user embeddings + all layer-0 biases pre-folded
    # into wx/ub); layer-1 columns carry the constant layer-1 bias.  Stored as bf16
    # to halve the VMEM scratch and the per-step vld traffic.
    x = x_ref[...].reshape(T * Bt, F)                      # bf16 already (wrapper cast)
    g_in = jnp.dot(x, wx_ref[...], preferred_element_type=jnp.float32)
    g_sc[...] = (g_in.reshape(T, Bt, G2) + ub_ref[...][None]).astype(g_sc.dtype)

    def gates(g, c):
        # One elementwise pass over 128-wide [layer0|layer1] slices (gate order i,f,g,o).
        g = g.astype(jnp.float32)
        i = jax.nn.sigmoid(g[:, 0:H2])
        f = jax.nn.sigmoid(g[:, H2:2 * H2])
        ci = jnp.tanh(g[:, 2 * H2:3 * H2])
        o = jax.nn.sigmoid(g[:, 3 * H2:4 * H2])
        c_new = f * c + i * ci
        return o * jnp.tanh(c_new), c_new

    # ---- prologue: layer-0 at t=0 (zero initial state -> the recurrent matmul
    # contributes nothing, so the gate pre-activation is just g_sc[0]).  The layer-1
    # lanes of the result are bias-only garbage; the true initial state is zero.
    h, c = gates(g_sc[0], jnp.zeros((Bt, H2), jnp.float32))
    keep0 = jax.lax.broadcasted_iota(jnp.int32, (Bt, H2), 1) < H
    h = jnp.where(keep0, h, 0.0)
    c = jnp.where(keep0, c, 0.0)

    # ---- phase-shifted recurrence: iteration t computes layer-1(t) AND layer-0(t+1)
    # from a single stacked matmul; h/c are carried as one [layer0|layer1] array so
    # there is no per-step concat.  The final iteration's layer-0 half is dead (never
    # read), so the scratch index is clamped to T-1 (whose layer-1 columns hold the
    # same constant bias as every other row).
    # TODO(synk): nn.LSTM inter-layer dropout (p=0.1) is train-only; eval semantics here.
    def step(t, carry):
        h, c = carry
        g = (jnp.dot(h.astype(jnp.bfloat16), ws_ref[...],
                     preferred_element_type=jnp.float32)
             + g_sc[jnp.minimum(t + 1, T - 1)])
        return gates(g, c)

    h, _ = jax.lax.fori_loop(0, T, step, (h, c),
                             unroll=True if T <= 16 else 8)

    # fc_out(lstm_out[:, -1, :]) — layer-1 hidden lives in lanes H:2H.
    out_ref[...] = (jnp.dot(h[:, H:H2].astype(jnp.bfloat16), wo_ref[...],
                            preferred_element_type=jnp.float32)
                    + bo_ref[...]).astype(out_ref.dtype)


def init_params(key):
    H, E = HIDDEN_DIM, EMBEDDING_DIM
    ks = iter(jax.random.split(key, 17))

    def w(shape, scale=0.1):
        return jax.random.normal(next(ks), shape, jnp.float32) * scale

    return dict(
        value_w=w((H // 2, INPUT_DIM)), value_b=w((H // 2,)),
        time_w=w((H // 4, TIME_DIM)),  time_b=w((H // 4,)),
        user_emb=w((NUM_USERS, E)),
        proj_w=w((H // 4, E)),         proj_b=w((H // 4,)),
        w_ih0=w((4 * H, H)), w_hh0=w((4 * H, H)),
        b_ih0=w((4 * H,)),   b_hh0=w((4 * H,)),
        w_ih1=w((4 * H, H)), w_hh1=w((4 * H, H)),
        b_ih1=w((4 * H,)),   b_hh1=w((4 * H,)),
        fc_w=w((PRED_LEN, H)), fc_b=w((PRED_LEN,)),
    )


def prepare_params(params):
    """One-time weight fusion / interleaving / casting (kept out of the per-call path)."""
    H = HIDDEN_DIM

    def interleave(m, slot):
        # (K, 4H) gate-blocked [i,f,g,o] -> (K, 8H) blocked [i0,i1,f0,f1,g0,g1,o0,o1]
        # with `m` placed in layer-slot `slot`, zeros elsewhere.
        K = m.shape[0]
        out = jnp.zeros((K, 4, 2, H), jnp.float32)
        out = out.at[:, :, slot, :].set(m.reshape(K, 4, H).astype(jnp.float32))
        return out.reshape(K, 8 * H)

    A = params["w_ih0"].T.astype(jnp.float32)                      # (H, 4H)
    A_v = A[: H // 2]                                              # rows seeing value_embed
    A_t = A[H // 2: H // 2 + H // 4]                               # rows seeing time_embed
    A_u = A[H // 2 + H // 4:]                                      # rows seeing user_embed

    # x_raw(12) -> layer-0 gate pre-activation (4H), embeddings folded in.
    wx4 = jnp.concatenate([params["value_w"].T @ A_v,
                           params["time_w"].T @ A_t], axis=0)      # (12, 4H)
    b0 = (params["value_b"] @ A_v + params["time_b"] @ A_t
          + params["proj_b"] @ A_u + params["b_ih0"] + params["b_hh0"])     # (4H,)
    # Per-user constant layer-0 gate bias (user_embedding -> projection -> gates + b0).
    user4 = params["user_emb"] @ params["proj_w"].T @ A_u + b0     # (NUM_USERS, 4H)
    b1 = (params["b_ih1"] + params["b_hh1"])[None, :]              # (1, 4H)

    # Stacked, phase-shifted recurrent weight: rows 0:H multiply h0(t) (-> layer-0
    # recurrent gates for t+1 and layer-1 input gates for t); rows H:2H multiply h1(t-1)
    # (-> layer-1 recurrent gates only).
    w_stack = jnp.concatenate(
        [interleave(params["w_hh0"].T, 0) + interleave(params["w_ih1"].T, 1),
         interleave(params["w_hh1"].T, 1)], axis=0)                # (2H, 8H)

    return dict(
        wx8=interleave(wx4, 0).astype(jnp.bfloat16),                               # (12, 8H)
        user_tab8=(interleave(user4, 0) + interleave(b1, 1)).astype(jnp.float32),  # (NUM_USERS, 8H)
        w_stack=w_stack.astype(jnp.bfloat16),                                      # (2H, 8H)
        w_out=params["fc_w"].T.astype(jnp.bfloat16),                               # (H, PRED_LEN)
        b_out=params["fc_b"][None, :].astype(jnp.float32),                         # (1, PRED_LEN)
    )


@jax.jit
def lstm_model_forward(prepared, x_values, x_time, user_id):
    B, T, _ = x_values.shape
    H = HIDDEN_DIM
    G2 = 8 * H

    # Batch tiling: sublane-aligned; for big batches use >=2 grid programs so the
    # "parallel" axis shards across both TensorCores on v7x; tiles capped at 256.
    B8 = _rup(B, 8)
    if B8 <= 128:
        Bt = B8
    else:
        n_tiles = max(2, _cdiv(B8, 256))
        Bt = _rup(_cdiv(B8, n_tiles), 8)
    Bp = _rup(B8, Bt)
    pad = Bp - B

    # Glue: concat raw features, time-major, bf16 (MXU consumes bf16 anyway), pad batch,
    # gather the per-user additive gate bias (user path + all biases pre-folded).
    x_raw = jnp.concatenate([x_values, x_time], axis=-1)            # (B, T, 12)
    x_raw = jnp.transpose(x_raw, (1, 0, 2)).astype(jnp.bfloat16)    # (T, B, 12)
    x_raw = jnp.pad(x_raw, ((0, 0), (0, pad), (0, 0)))
    uid = jnp.pad(user_id, (0, pad))
    u_bias = prepared["user_tab8"][uid]                             # (Bp, 8H) f32

    # VMEM budget: raise the scoped limit only when the footprint exceeds the smallest
    # default (v5e 16 MiB); cap at 64 MiB (v7x physical VMEM per TC).
    est_vmem = (2 * T * Bt * 128 * 2        # x (bf16, lane-padded), double-buffered
                + 2 * Bt * G2 * 4           # per-user additive (f32), double-buffered
                + T * Bt * G2 * 2           # gate scratch (bf16)
                + 6 * (2 * H) * G2 * 2      # resident weights (generous)
                + 4 * Bt * 128 * 4)         # output + slack
    cp_kwargs = dict(dimension_semantics=("parallel",))
    if est_vmem > 12 * 1024 * 1024:
        cp_kwargs["vmem_limit_bytes"] = min(2 * est_vmem, 64 * 1024 * 1024)

    grid_spec = pltpu.PrefetchScalarGridSpec(
        num_scalar_prefetch=0,
        grid=(Bp // Bt,),
        in_specs=[
            pl.BlockSpec((T, Bt, FEAT_DIM), lambda b: (0, b, 0)),   # raw features (bf16)
            pl.BlockSpec((Bt, G2), lambda b: (b, 0)),               # per-user gate bias
            pl.BlockSpec((FEAT_DIM, G2), lambda b: (0, 0)),         # fused input weight
            pl.BlockSpec((2 * H, G2), lambda b: (0, 0)),            # stacked recurrent weight
            pl.BlockSpec((H, PRED_LEN), lambda b: (0, 0)),          # fc_w^T
            pl.BlockSpec((1, PRED_LEN), lambda b: (0, 0)),          # fc_b
        ],
        out_specs=pl.BlockSpec((Bt, PRED_LEN), lambda b: (b, 0)),
        scratch_shapes=[pltpu.VMEM((T, Bt, G2), jnp.bfloat16)],
    )
    out = pl.pallas_call(
        _lstm_kernel,
        out_shape=jax.ShapeDtypeStruct((Bp, PRED_LEN), jnp.float32),
        grid_spec=grid_spec,
        compiler_params=pltpu.CompilerParams(**cp_kwargs),
    )(x_raw, u_bias, prepared["wx8"], prepared["w_stack"],
      prepared["w_out"], prepared["b_out"])
    return out[:B]


def reference_forward(params, x_values, x_time, user_id):
    """Pure-JAX reference with identical semantics (eval mode, no dropout)."""
    H = HIDDEN_DIM
    B, T, _ = x_values.shape
    ve = x_values @ params["value_w"].T + params["value_b"]
    te = x_time @ params["time_w"].T + params["time_b"]
    ue = params["user_emb"][user_id] @ params["proj_w"].T + params["proj_b"]
    ue = jnp.broadcast_to(ue[:, None, :], (B, T, H // 4))
    x = jnp.concatenate([ve, te, ue], axis=-1)

    def layer(x_seq, w_ih, w_hh, b):
        def step(carry, x_t):
            h, c = carry
            g = x_t @ w_ih.T + h @ w_hh.T + b
            i, f, gg, o = jnp.split(g, 4, axis=-1)
            c = jax.nn.sigmoid(f) * c + jax.nn.sigmoid(i) * jnp.tanh(gg)
            h = jax.nn.sigmoid(o) * jnp.tanh(c)
            return (h, c), h
        init = (jnp.zeros((B, H), jnp.float32), jnp.zeros((B, H), jnp.float32))
        _, hs = jax.lax.scan(step, init, jnp.transpose(x_seq, (1, 0, 2)))
        return jnp.transpose(hs, (1, 0, 2))

    h = layer(x, params["w_ih0"], params["w_hh0"], params["b_ih0"] + params["b_hh0"])
    h = layer(h, params["w_ih1"], params["w_hh1"], params["b_ih1"] + params["b_hh1"])
    return h[:, -1, :] @ params["fc_w"].T + params["fc_b"]


if __name__ == "__main__":
    key = jax.random.PRNGKey(0)
    kp, kv, kt, ku = jax.random.split(key, 4)
    params = init_params(kp)
    prepared = prepare_params(params)   # one-time fusion, cached outside the forward

    B, T = 2, 8
    x_values = jax.random.normal(kv, (B, T, INPUT_DIM), jnp.float32)
    x_time = jax.random.normal(kt, (B, T, TIME_DIM), jnp.float32)
    user_id = jax.random.randint(ku, (B,), 0, NUM_USERS)

    out = jax.block_until_ready(lstm_model_forward(prepared, x_values, x_time, user_id))
    ref = reference_forward(params, x_values, x_time, user_id)

    assert out.shape == (B, PRED_LEN), out.shape
    # bf16 MXU operands + bf16 gate-input scratch (f32 accumulation / elementwise)
    # -> slightly looser tolerance than pure-f32.
    assert jnp.allclose(out, ref, atol=4e-2, rtol=4e-2), (out, ref)
    print("KERNEL_OK")
</pallas_src>

<mosaic_0001>
module attributes {stable_mosaic.version = 11 : i64} {
  func.func @_lstm_kernel(%arg0: i32, %arg1: memref<8x8x12xbf16, #tpu.memory_space<vmem>>, %arg2: memref<8x512xf32, #tpu.memory_space<vmem>>, %arg3: memref<12x512xbf16, #tpu.memory_space<vmem>>, %arg4: memref<128x512xbf16, #tpu.memory_space<vmem>>, %arg5: memref<64x5xbf16, #tpu.memory_space<vmem>>, %arg6: memref<1x5xf32, #tpu.memory_space<vmem>>, %arg7: memref<8x5xf32, #tpu.memory_space<vmem>>, %arg8: memref<8x8x512xbf16, #tpu.memory_space<vmem>>) attributes {dimension_semantics = [#tpu.dimension_semantics<parallel>], iteration_bounds = array<i64: 1>, scalar_prefetch = 0 : i64, scratch_operands = 1 : i64, tpu.core_type = #tpu.core_type<tc>, window_params = [{transform_indices = @transform_0, window_bounds = array<i64: 8, 8, 12>}, {transform_indices = @transform_1, window_bounds = array<i64: 8, 512>}, {pipeline_mode = #tpu.pipeline_mode<synchronous>, transform_indices = @transform_2, window_bounds = array<i64: 12, 512>}, {pipeline_mode = #tpu.pipeline_mode<synchronous>, transform_indices = @transform_3, window_bounds = array<i64: 128, 512>}, {pipeline_mode = #tpu.pipeline_mode<synchronous>, transform_indices = @transform_4, window_bounds = array<i64: 64, 5>}, {pipeline_mode = #tpu.pipeline_mode<synchronous>, transform_indices = @transform_5, window_bounds = array<i64: 1, 5>}, {transform_indices = @transform_6, window_bounds = array<i64: 8, 5>}]} {
    %c0 = arith.constant 0 : index
    %c0_0 = arith.constant 0 : index
    %c0_1 = arith.constant 0 : index
    %0 = vector.load %arg1[%c0, %c0_0, %c0_1] : memref<8x8x12xbf16, #tpu.memory_space<vmem>>, vector<8x8x12xbf16>
    %1 = vector.shape_cast %0 : vector<8x8x12xbf16> to vector<64x12xbf16>
    %c0_2 = arith.constant 0 : index
    %c0_3 = arith.constant 0 : index
    %2 = vector.load %arg3[%c0_2, %c0_3] : memref<12x512xbf16, #tpu.memory_space<vmem>>, vector<12x512xbf16>
    %cst = arith.constant dense<0.000000e+00> : vector<64x512xf32>
    %3 = tpu.matmul %1, %2, %cst {dimension_numbers = #tpu.dot_dimension_numbers<[1], [0], [0], [1], [0, 0, 1, 1], [], []>} : vector<64x12xbf16>, vector<12x512xbf16>, vector<64x512xf32> -> vector<64x512xf32>
    %4 = vector.shape_cast %3 : vector<64x512xf32> to vector<8x8x512xf32>
    %c0_4 = arith.constant 0 : index
    %c0_5 = arith.constant 0 : index
    %5 = vector.load %arg2[%c0_4, %c0_5] : memref<8x512xf32, #tpu.memory_space<vmem>>, vector<8x512xf32>
    %6 = vector.shape_cast %5 : vector<8x512xf32> to vector<1x8x512xf32>
    %7 = vector.broadcast %6 : vector<1x8x512xf32> to vector<8x8x512xf32>
    %8 = arith.addf %4, %7 : vector<8x8x512xf32>
    %9 = arith.truncf %8 : vector<8x8x512xf32> to vector<8x8x512xbf16>
    %c0_6 = arith.constant 0 : index
    %c0_7 = arith.constant 0 : index
    %c0_8 = arith.constant 0 : index
    %10 = vector.load %arg8[%c0_6, %c0_7, %c0_8] : memref<8x8x512xbf16, #tpu.memory_space<vmem>>, vector<8x8x512xbf16>
    tpu.vector_store %arg8[%c0_6, %c0_7, %c0_8], %9 {strides = array<i32>} : memref<8x8x512xbf16, #tpu.memory_space<vmem>>, vector<8x8x512xbf16>,
    %c0_9 = arith.constant 0 : index
    %c0_10 = arith.constant 0 : index
    %c0_11 = arith.constant 0 : index
    %11 = vector.load %arg8[%c0_9, %c0_10, %c0_11] : memref<8x8x512xbf16, #tpu.memory_space<vmem>>, vector<1x8x512xbf16>
    %12 = vector.shape_cast %11 : vector<1x8x512xbf16> to vector<8x512xbf16>
    %cst_12 = arith.constant 0.000000e+00 : f32
    %13 = vector.broadcast %cst_12 : f32 to vector<8x128xf32>
    %14 = arith.extf %12 : vector<8x512xbf16> to vector<8x512xf32>
    %15 = vector.extract_strided_slice %14 {offsets = [0, 0], sizes = [8, 128], strides = [1, 1]} : vector<8x512xf32> to vector<8x128xf32>
    %16 = arith.negf %15 : vector<8x128xf32>
    %17 = math.exp %16 : vector<8x128xf32>
    %cst_13 = arith.constant 1.000000e+00 : f32
    %18 = vector.broadcast %cst_13 : f32 to vector<8x128xf32>
    %19 = arith.addf %18, %17 : vector<8x128xf32>
    %20 = arith.divf %18, %19 : vector<8x128xf32>
    %21 = vector.extract_strided_slice %14 {offsets = [0, 128], sizes = [8, 128], strides = [1, 1]} : vector<8x512xf32> to vector<8x128xf32>
    %22 = arith.negf %21 : vector<8x128xf32>
    %23 = math.exp %22 : vector<8x128xf32>
    %cst_14 = arith.constant 1.000000e+00 : f32
    %24 = vector.broadcast %cst_14 : f32 to vector<8x128xf32>
    %25 = arith.addf %24, %23 : vector<8x128xf32>
    %26 = arith.divf %24, %25 : vector<8x128xf32>
    %27 = vector.extract_strided_slice %14 {offsets = [0, 256], sizes = [8, 128], strides = [1, 1]} : vector<8x512xf32> to vector<8x128xf32>
    %28 = math.tanh %27 : vector<8x128xf32>
    %29 = vector.extract_strided_slice %14 {offsets = [0, 384], sizes = [8, 128], strides = [1, 1]} : vector<8x512xf32> to vector<8x128xf32>
    %30 = arith.negf %29 : vector<8x128xf32>
    %31 = math.exp %30 : vector<8x128xf32>
    %cst_15 = arith.constant 1.000000e+00 : f32
    %32 = vector.broadcast %cst_15 : f32 to vector<8x128xf32>
    %33 = arith.addf %32, %31 : vector<8x128xf32>
    %34 = arith.divf %32, %33 : vector<8x128xf32>
    %35 = arith.mulf %26, %13 : vector<8x128xf32>
    %36 = arith.mulf %20, %28 : vector<8x128xf32>
    %37 = arith.addf %35, %36 : vector<8x128xf32>
    %38 = math.tanh %37 : vector<8x128xf32>
    %39 = arith.mulf %34, %38 : vector<8x128xf32>
    %40 = tpu.iota {dimensions = array<i32: 1>} : vector<8x128xi32>
    %c64_i32 = arith.constant 64 : i32
    %41 = vector.broadcast %c64_i32 : i32 to vector<8x128xi32>
    %42 = arith.cmpi slt, %40, %41 : vector<8x128xi32>
    %cst_16 = arith.constant 0.000000e+00 : f32
    %43 = vector.broadcast %cst_16 : f32 to vector<8x128xf32>
    %44 = arith.select %42, %39, %43 : vector<8x128xi1>, vector<8x128xf32>
    %cst_17 = arith.constant 0.000000e+00 : f32
    %45 = vector.broadcast %cst_17 : f32 to vector<8x128xf32>
    %46 = arith.select %42, %37, %45 : vector<8x128xi1>, vector<8x128xf32>
    %c0_i32 = arith.constant 0 : i32
    %47 = arith.truncf %44 : vector<8x128xf32> to vector<8x128xbf16>
    %c0_18 = arith.constant 0 : index
    %c0_19 = arith.constant 0 : index
    %48 = vector.load %arg4[%c0_18, %c0_19] : memref<128x512xbf16, #tpu.memory_space<vmem>>, vector<128x512xbf16>
    %cst_20 = arith.constant dense<0.000000e+00> : vector<8x512xf32>
    %49 = tpu.matmul %47, %48, %cst_20 {dimension_numbers = #tpu.dot_dimension_numbers<[1], [0], [0], [1], [0, 0, 1, 1], [], []>} : vector<8x128xbf16>, vector<128x512xbf16>, vector<8x512xf32> -> vector<8x512xf32>
    %c1_i32 = arith.constant 1 : i32
    %50 = arith.addi %c0_i32, %c1_i32 : i32
    %c7_i32 = arith.constant 7 : i32
    %51 = arith.minsi %50, %c7_i32 : i32
    %52 = arith.index_cast %51 : i32 to index
    %c0_21 = arith.constant 0 : index
    %c0_22 = arith.constant 0 : index
    %53 = vector.load %arg8[%52, %c0_21, %c0_22] : memref<8x8x512xbf16, #tpu.memory_space<vmem>>, vector<1x8x512xbf16>
    %54 = vector.shape_cast %53 : vector<1x8x512xbf16> to vector<8x512xbf16>
    %55 = arith.extf %54 : vector<8x512xbf16> to vector<8x512xf32>
    %56 = arith.addf %49, %55 : vector<8x512xf32>
    %57 = vector.extract_strided_slice %56 {offsets = [0, 0], sizes = [8, 128], strides = [1, 1]} : vector<8x512xf32> to vector<8x128xf32>
    %58 = arith.negf %57 : vector<8x128xf32>
    %59 = math.exp %58 : vector<8x128xf32>
    %cst_23 = arith.constant 1.000000e+00 : f32
    %60 = vector.broadcast %cst_23 : f32 to vector<8x128xf32>
    %61 = arith.addf %60, %59 : vector<8x128xf32>
    %62 = arith.divf %60, %61 : vector<8x128xf32>
    %63 = vector.extract_strided_slice %56 {offsets = [0, 128], sizes = [8, 128], strides = [1, 1]} : vector<8x512xf32> to vector<8x128xf32>
    %64 = arith.negf %63 : vector<8x128xf32>
    %65 = math.exp %64 : vector<8x128xf32>
    %cst_24 = arith.constant 1.000000e+00 : f32
    %66 = vector.broadcast %cst_24 : f32 to vector<8x128xf32>
    %67 = arith.addf %66, %65 : vector<8x128xf32>
    %68 = arith.divf %66, %67 : vector<8x128xf32>
    %69 = vector.extract_strided_slice %56 {offsets = [0, 256], sizes = [8, 128], strides = [1, 1]} : vector<8x512xf32> to vector<8x128xf32>
    %70 = math.tanh %69 : vector<8x128xf32>
    %71 = vector.extract_strided_slice %56 {offsets = [0, 384], sizes = [8, 128], strides = [1, 1]} : vector<8x512xf32> to vector<8x128xf32>
    %72 = arith.negf %71 : vector<8x128xf32>
    %73 = math.exp %72 : vector<8x128xf32>
    %cst_25 = arith.constant 1.000000e+00 : f32
    %74 = vector.broadcast %cst_25 : f32 to vector<8x128xf32>
    %75 = arith.addf %74, %73 : vector<8x128xf32>
    %76 = arith.divf %74, %75 : vector<8x128xf32>
    %77 = arith.mulf %68, %46 : vector<8x128xf32>
    %78 = arith.mulf %62, %70 : vector<8x128xf32>
    %79 = arith.addf %77, %78 : vector<8x128xf32>
    %80 = math.tanh %79 : vector<8x128xf32>
    %81 = arith.mulf %76, %80 : vector<8x128xf32>
    %c1_i32_26 = arith.constant 1 : i32
    %82 = arith.truncf %81 : vector<8x128xf32> to vector<8x128xbf16>
    %c0_27 = arith.constant 0 : index
    %c0_28 = arith.constant 0 : index
    %83 = vector.load %arg4[%c0_27, %c0_28] : memref<128x512xbf16, #tpu.memory_space<vmem>>, vector<128x512xbf16>
    %cst_29 = arith.constant dense<0.000000e+00> : vector<8x512xf32>
    %84 = tpu.matmul %82, %83, %cst_29 {dimension_numbers = #tpu.dot_dimension_numbers<[1], [0], [0], [1], [0, 0, 1, 1], [], []>} : vector<8x128xbf16>, vector<128x512xbf16>, vector<8x512xf32> -> vector<8x512xf32>
    %c1_i32_30 = arith.constant 1 : i32
    %85 = arith.addi %c1_i32_26, %c1_i32_30 : i32
    %c7_i32_31 = arith.constant 7 : i32
    %86 = arith.minsi %85, %c7_i32_31 : i32
    %87 = arith.index_cast %86 : i32 to index
    %c0_32 = arith.constant 0 : index
    %c0_33 = arith.constant 0 : index
    %88 = vector.load %arg8[%87, %c0_32, %c0_33] : memref<8x8x512xbf16, #tpu.memory_space<vmem>>, vector<1x8x512xbf16>
    %89 = vector.shape_cast %88 : vector<1x8x512xbf16> to vector<8x512xbf16>
    %90 = arith.extf %89 : vector<8x512xbf16> to vector<8x512xf32>
    %91 = arith.addf %84, %90 : vector<8x512xf32>
    %92 = vector.extract_strided_slice %91 {offsets = [0, 0], sizes = [8, 128], strides = [1, 1]} : vector<8x512xf32> to vector<8x128xf32>
    %93 = arith.negf %92 : vector<8x128xf32>
    %94 = math.exp %93 : vector<8x128xf32>
    %cst_34 = arith.constant 1.000000e+00 : f32
    %95 = vector.broadcast %cst_34 : f32 to vector<8x128xf32>
    %96 = arith.addf %95, %94 : vector<8x128xf32>
    %97 = arith.divf %95, %96 : vector<8x128xf32>
    %98 = vector.extract_strided_slice %91 {offsets = [0, 128], sizes = [8, 128], strides = [1, 1]} : vector<8x512xf32> to vector<8x128xf32>
    %99 = arith.negf %98 : vector<8x128xf32>
    %100 = math.exp %99 : vector<8x128xf32>
    %cst_35 = arith.constant 1.000000e+00 : f32
    %101 = vector.broadcast %cst_35 : f32 to vector<8x128xf32>
    %102 = arith.addf %101, %100 : vector<8x128xf32>
    %103 = arith.divf %101, %102 : vector<8x128xf32>
    %104 = vector.extract_strided_slice %91 {offsets = [0, 256], sizes = [8, 128], strides = [1, 1]} : vector<8x512xf32> to vector<8x128xf32>
    %105 = math.tanh %104 : vector<8x128xf32>
    %106 = vector.extract_strided_slice %91 {offsets = [0, 384], sizes = [8, 128], strides = [1, 1]} : vector<8x512xf32> to vector<8x128xf32>
    %107 = arith.negf %106 : vector<8x128xf32>
    %108 = math.exp %107 : vector<8x128xf32>
    %cst_36 = arith.constant 1.000000e+00 : f32
    %109 = vector.broadcast %cst_36 : f32 to vector<8x128xf32>
    %110 = arith.addf %109, %108 : vector<8x128xf32>
    %111 = arith.divf %109, %110 : vector<8x128xf32>
    %112 = arith.mulf %103, %79 : vector<8x128xf32>
    %113 = arith.mulf %97, %105 : vector<8x128xf32>
    %114 = arith.addf %112, %113 : vector<8x128xf32>
    %115 = math.tanh %114 : vector<8x128xf32>
    %116 = arith.mulf %111, %115 : vector<8x128xf32>
    %c2_i32 = arith.constant 2 : i32
    %117 = arith.truncf %116 : vector<8x128xf32> to vector<8x128xbf16>
    %c0_37 = arith.constant 0 : index
    %c0_38 = arith.constant 0 : index
    %118 = vector.load %arg4[%c0_37, %c0_38] : memref<128x512xbf16, #tpu.memory_space<vmem>>, vector<128x512xbf16>
    %cst_39 = arith.constant dense<0.000000e+00> : vector<8x512xf32>
    %119 = tpu.matmul %117, %118, %cst_39 {dimension_numbers = #tpu.dot_dimension_numbers<[1], [0], [0], [1], [0, 0, 1, 1], [], []>} : vector<8x128xbf16>, vector<128x512xbf16>, vector<8x512xf32> -> vector<8x512xf32>
    %c1_i32_40 = arith.constant 1 : i32
    %120 = arith.addi %c2_i32, %c1_i32_40 : i32
    %c7_i32_41 = arith.constant 7 : i32
    %121 = arith.minsi %120, %c7_i32_41 : i32
    %122 = arith.index_cast %121 : i32 to index
    %c0_42 = arith.constant 0 : index
    %c0_43 = arith.constant 0 : index
    %123 = vector.load %arg8[%122, %c0_42, %c0_43] : memref<8x8x512xbf16, #tpu.memory_space<vmem>>, vector<1x8x512xbf16>
    %124 = vector.shape_cast %123 : vector<1x8x512xbf16> to vector<8x512xbf16>
    %125 = arith.extf %124 : vector<8x512xbf16> to vector<8x512xf32>
    %126 = arith.addf %119, %125 : vector<8x512xf32>
    %127 = vector.extract_strided_slice %126 {offsets = [0, 0], sizes = [8, 128], strides = [1, 1]} : vector<8x512xf32> to vector<8x128xf32>
    %128 = arith.negf %127 : vector<8x128xf32>
    %129 = math.exp %128 : vector<8x128xf32>
    %cst_44 = arith.constant 1.000000e+00 : f32
    %130 = vector.broadcast %cst_44 : f32 to vector<8x128xf32>
    %131 = arith.addf %130, %129 : vector<8x128xf32>
    %132 = arith.divf %130, %131 : vector<8x128xf32>
    %133 = vector.extract_strided_slice %126 {offsets = [0, 128], sizes = [8, 128], strides = [1, 1]} : vector<8x512xf32> to vector<8x128xf32>
    %134 = arith.negf %133 : vector<8x128xf32>
    %135 = math.exp %134 : vector<8x128xf32>
    %cst_45 = arith.constant 1.000000e+00 : f32
    %136 = vector.broadcast %cst_45 : f32 to vector<8x128xf32>
    %137 = arith.addf %136, %135 : vector<8x128xf32>
    %138 = arith.divf %136, %137 : vector<8x128xf32>
    %139 = vector.extract_strided_slice %126 {offsets = [0, 256], sizes = [8, 128], strides = [1, 1]} : vector<8x512xf32> to vector<8x128xf32>
    %140 = math.tanh %139 : vector<8x128xf32>
    %141 = vector.extract_strided_slice %126 {offsets = [0, 384], sizes = [8, 128], strides = [1, 1]} : vector<8x512xf32> to vector<8x128xf32>
    %142 = arith.negf %141 : vector<8x128xf32>
    %143 = math.exp %142 : vector<8x128xf32>
    %cst_46 = arith.constant 1.000000e+00 : f32
    %144 = vector.broadcast %cst_46 : f32 to vector<8x128xf32>
    %145 = arith.addf %144, %143 : vector<8x128xf32>
    %146 = arith.divf %144, %145 : vector<8x128xf32>
    %147 = arith.mulf %138, %114 : vector<8x128xf32>
    %148 = arith.mulf %132, %140 : vector<8x128xf32>
    %149 = arith.addf %147, %148 : vector<8x128xf32>
    %150 = math.tanh %149 : vector<8x128xf32>
    %151 = arith.mulf %146, %150 : vector<8x128xf32>
    %c3_i32 = arith.constant 3 : i32
    %152 = arith.truncf %151 : vector<8x128xf32> to vector<8x128xbf16>
    %c0_47 = arith.constant 0 : index
    %c0_48 = arith.constant 0 : index
    %153 = vector.load %arg4[%c0_47, %c0_48] : memref<128x512xbf16, #tpu.memory_space<vmem>>, vector<128x512xbf16>
    %cst_49 = arith.constant dense<0.000000e+00> : vector<8x512xf32>
    %154 = tpu.matmul %152, %153, %cst_49 {dimension_numbers = #tpu.dot_dimension_numbers<[1], [0], [0], [1], [0, 0, 1, 1], [], []>} : vector<8x128xbf16>, vector<128x512xbf16>, vector<8x512xf32> -> vector<8x512xf32>
    %c1_i32_50 = arith.constant 1 : i32
    %155 = arith.addi %c3_i32, %c1_i32_50 : i32
    %c7_i32_51 = arith.constant 7 : i32
    %156 = arith.minsi %155, %c7_i32_51 : i32
    %157 = arith.index_cast %156 : i32 to index
    %c0_52 = arith.constant 0 : index
    %c0_53 = arith.constant 0 : index
    %158 = vector.load %arg8[%157, %c0_52, %c0_53] : memref<8x8x512xbf16, #tpu.memory_space<vmem>>, vector<1x8x512xbf16>
    %159 = vector.shape_cast %158 : vector<1x8x512xbf16> to vector<8x512xbf16>
    %160 = arith.extf %159 : vector<8x512xbf16> to vector<8x512xf32>
    %161 = arith.addf %154, %160 : vector<8x512xf32>
    %162 = vector.extract_strided_slice %161 {offsets = [0, 0], sizes = [8, 128], strides = [1, 1]} : vector<8x512xf32> to vector<8x128xf32>
    %163 = arith.negf %162 : vector<8x128xf32>
    %164 = math.exp %163 : vector<8x128xf32>
    %cst_54 = arith.constant 1.000000e+00 : f32
    %165 = vector.broadcast %cst_54 : f32 to vector<8x128xf32>
    %166 = arith.addf %165, %164 : vector<8x128xf32>
    %167 = arith.divf %165, %166 : vector<8x128xf32>
    %168 = vector.extract_strided_slice %161 {offsets = [0, 128], sizes = [8, 128], strides = [1, 1]} : vector<8x512xf32> to vector<8x128xf32>
    %169 = arith.negf %168 : vector<8x128xf32>
    %170 = math.exp %169 : vector<8x128xf32>
    %cst_55 = arith.constant 1.000000e+00 : f32
    %171 = vector.broadcast %cst_55 : f32 to vector<8x128xf32>
    %172 = arith.addf %171, %170 : vector<8x128xf32>
    %173 = arith.divf %171, %172 : vector<8x128xf32>
    %174 = vector.extract_strided_slice %161 {offsets = [0, 256], sizes = [8, 128], strides = [1, 1]} : vector<8x512xf32> to vector<8x128xf32>
    %175 = math.tanh %174 : vector<8x128xf32>
    %176 = vector.extract_strided_slice %161 {offsets = [0, 384], sizes = [8, 128], strides = [1, 1]} : vector<8x512xf32> to vector<8x128xf32>
    %177 = arith.negf %176 : vector<8x128xf32>
    %178 = math.exp %177 : vector<8x128xf32>
    %cst_56 = arith.constant 1.000000e+00 : f32
    %179 = vector.broadcast %cst_56 : f32 to vector<8x128xf32>
    %180 = arith.addf %179, %178 : vector<8x128xf32>
    %181 = arith.divf %179, %180 : vector<8x128xf32>
    %182 = arith.mulf %173, %149 : vector<8x128xf32>
    %183 = arith.mulf %167, %175 : vector<8x128xf32>
    %184 = arith.addf %182, %183 : vector<8x128xf32>
    %185 = math.tanh %184 : vector<8x128xf32>
    %186 = arith.mulf %181, %185 : vector<8x128xf32>
    %c4_i32 = arith.constant 4 : i32
    %187 = arith.truncf %186 : vector<8x128xf32> to vector<8x128xbf16>
    %c0_57 = arith.constant 0 : index
    %c0_58 = arith.constant 0 : index
    %188 = vector.load %arg4[%c0_57, %c0_58] : memref<128x512xbf16, #tpu.memory_space<vmem>>, vector<128x512xbf16>
    %cst_59 = arith.constant dense<0.000000e+00> : vector<8x512xf32>
    %189 = tpu.matmul %187, %188, %cst_59 {dimension_numbers = #tpu.dot_dimension_numbers<[1], [0], [0], [1], [0, 0, 1, 1], [], []>} : vector<8x128xbf16>, vector<128x512xbf16>, vector<8x512xf32> -> vector<8x512xf32>
    %c1_i32_60 = arith.constant 1 : i32
    %190 = arith.addi %c4_i32, %c1_i32_60 : i32
    %c7_i32_61 = arith.constant 7 : i32
    %191 = arith.minsi %190, %c7_i32_61 : i32
    %192 = arith.index_cast %191 : i32 to index
    %c0_62 = arith.constant 0 : index
    %c0_63 = arith.constant 0 : index
    %193 = vector.load %arg8[%192, %c0_62, %c0_63] : memref<8x8x512xbf16, #tpu.memory_space<vmem>>, vector<1x8x512xbf16>
    %194 = vector.shape_cast %193 : vector<1x8x512xbf16> to vector<8x512xbf16>
    %195 = arith.extf %194 : vector<8x512xbf16> to vector<8x512xf32>
    %196 = arith.addf %189, %195 : vector<8x512xf32>
    %197 = vector.extract_strided_slice %196 {offsets = [0, 0], sizes = [8, 128], strides = [1, 1]} : vector<8x512xf32> to vector<8x128xf32>
    %198 = arith.negf %197 : vector<8x128xf32>
    %199 = math.exp %198 : vector<8x128xf32>
    %cst_64 = arith.constant 1.000000e+00 : f32
    %200 = vector.broadcast %cst_64 : f32 to vector<8x128xf32>
    %201 = arith.addf %200, %199 : vector<8x128xf32>
    %202 = arith.divf %200, %201 : vector<8x128xf32>
    %203 = vector.extract_strided_slice %196 {offsets = [0, 128], sizes = [8, 128], strides = [1, 1]} : vector<8x512xf32> to vector<8x128xf32>
    %204 = arith.negf %203 : vector<8x128xf32>
    %205 = math.exp %204 : vector<8x128xf32>
    %cst_65 = arith.constant 1.000000e+00 : f32
    %206 = vector.broadcast %cst_65 : f32 to vector<8x128xf32>
    %207 = arith.addf %206, %205 : vector<8x128xf32>
    %208 = arith.divf %206, %207 : vector<8x128xf32>
    %209 = vector.extract_strided_slice %196 {offsets = [0, 256], sizes = [8, 128], strides = [1, 1]} : vector<8x512xf32> to vector<8x128xf32>
    %210 = math.tanh %209 : vector<8x128xf32>
    %211 = vector.extract_strided_slice %196 {offsets = [0, 384], sizes = [8, 128], strides = [1, 1]} : vector<8x512xf32> to vector<8x128xf32>
    %212 = arith.negf %211 : vector<8x128xf32>
    %213 = math.exp %212 : vector<8x128xf32>
    %cst_66 = arith.constant 1.000000e+00 : f32
    %214 = vector.broadcast %cst_66 : f32 to vector<8x128xf32>
    %215 = arith.addf %214, %213 : vector<8x128xf32>
    %216 = arith.divf %214, %215 : vector<8x128xf32>
    %217 = arith.mulf %208, %184 : vector<8x128xf32>
    %218 = arith.mulf %202, %210 : vector<8x128xf32>
    %219 = arith.addf %217, %218 : vector<8x128xf32>
    %220 = math.tanh %219 : vector<8x128xf32>
    %221 = arith.mulf %216, %220 : vector<8x128xf32>
    %c5_i32 = arith.constant 5 : i32
    %222 = arith.truncf %221 : vector<8x128xf32> to vector<8x128xbf16>
    %c0_67 = arith.constant 0 : index
    %c0_68 = arith.constant 0 : index
    %223 = vector.load %arg4[%c0_67, %c0_68] : memref<128x512xbf16, #tpu.memory_space<vmem>>, vector<128x512xbf16>
    %cst_69 = arith.constant dense<0.000000e+00> : vector<8x512xf32>
    %224 = tpu.matmul %222, %223, %cst_69 {dimension_numbers = #tpu.dot_dimension_numbers<[1], [0], [0], [1], [0, 0, 1, 1], [], []>} : vector<8x128xbf16>, vector<128x512xbf16>, vector<8x512xf32> -> vector<8x512xf32>
    %c1_i32_70 = arith.constant 1 : i32
    %225 = arith.addi %c5_i32, %c1_i32_70 : i32
    %c7_i32_71 = arith.constant 7 : i32
    %226 = arith.minsi %225, %c7_i32_71 : i32
    %227 = arith.index_cast %226 : i32 to index
    %c0_72 = arith.constant 0 : index
    %c0_73 = arith.constant 0 : index
    %228 = vector.load %arg8[%227, %c0_72, %c0_73] : memref<8x8x512xbf16, #tpu.memory_space<vmem>>, vector<1x8x512xbf16>
    %229 = vector.shape_cast %228 : vector<1x8x512xbf16> to vector<8x512xbf16>
    %230 = arith.extf %229 : vector<8x512xbf16> to vector<8x512xf32>
    %231 = arith.addf %224, %230 : vector<8x512xf32>
    %232 = vector.extract_strided_slice %231 {offsets = [0, 0], sizes = [8, 128], strides = [1, 1]} : vector<8x512xf32> to vector<8x128xf32>
    %233 = arith.negf %232 : vector<8x128xf32>
    %234 = math.exp %233 : vector<8x128xf32>
    %cst_74 = arith.constant 1.000000e+00 : f32
    %235 = vector.broadcast %cst_74 : f32 to vector<8x128xf32>
    %236 = arith.addf %235, %234 : vector<8x128xf32>
    %237 = arith.divf %235, %236 : vector<8x128xf32>
    %238 = vector.extract_strided_slice %231 {offsets = [0, 128], sizes = [8, 128], strides = [1, 1]} : vector<8x512xf32> to vector<8x128xf32>
    %239 = arith.negf %238 : vector<8x128xf32>
    %240 = math.exp %239 : vector<8x128xf32>
    %cst_75 = arith.constant 1.000000e+00 : f32
    %241 = vector.broadcast %cst_75 : f32 to vector<8x128xf32>
    %242 = arith.addf %241, %240 : vector<8x128xf32>
    %243 = arith.divf %241, %242 : vector<8x128xf32>
    %244 = vector.extract_strided_slice %231 {offsets = [0, 256], sizes = [8, 128], strides = [1, 1]} : vector<8x512xf32> to vector<8x128xf32>
    %245 = math.tanh %244 : vector<8x128xf32>
    %246 = vector.extract_strided_slice %231 {offsets = [0, 384], sizes = [8, 128], strides = [1, 1]} : vector<8x512xf32> to vector<8x128xf32>
    %247 = arith.negf %246 : vector<8x128xf32>
    %248 = math.exp %247 : vector<8x128xf32>
    %cst_76 = arith.constant 1.000000e+00 : f32
    %249 = vector.broadcast %cst_76 : f32 to vector<8x128xf32>
    %250 = arith.addf %249, %248 : vector<8x128xf32>
    %251 = arith.divf %249, %250 : vector<8x128xf32>
    %252 = arith.mulf %243, %219 : vector<8x128xf32>
    %253 = arith.mulf %237, %245 : vector<8x128xf32>
    %254 = arith.addf %252, %253 : vector<8x128xf32>
    %255 = math.tanh %254 : vector<8x128xf32>
    %256 = arith.mulf %251, %255 : vector<8x128xf32>
    %c6_i32 = arith.constant 6 : i32
    %257 = arith.truncf %256 : vector<8x128xf32> to vector<8x128xbf16>
    %c0_77 = arith.constant 0 : index
    %c0_78 = arith.constant 0 : index
    %258 = vector.load %arg4[%c0_77, %c0_78] : memref<128x512xbf16, #tpu.memory_space<vmem>>, vector<128x512xbf16>
    %cst_79 = arith.constant dense<0.000000e+00> : vector<8x512xf32>
    %259 = tpu.matmul %257, %258, %cst_79 {dimension_numbers = #tpu.dot_dimension_numbers<[1], [0], [0], [1], [0, 0, 1, 1], [], []>} : vector<8x128xbf16>, vector<128x512xbf16>, vector<8x512xf32> -> vector<8x512xf32>
    %c1_i32_80 = arith.constant 1 : i32
    %260 = arith.addi %c6_i32, %c1_i32_80 : i32
    %c7_i32_81 = arith.constant 7 : i32
    %261 = arith.minsi %260, %c7_i32_81 : i32
    %262 = arith.index_cast %261 : i32 to index
    %c0_82 = arith.constant 0 : index
    %c0_83 = arith.constant 0 : index
    %263 = vector.load %arg8[%262, %c0_82, %c0_83] : memref<8x8x512xbf16, #tpu.memory_space<vmem>>, vector<1x8x512xbf16>
    %264 = vector.shape_cast %263 : vector<1x8x512xbf16> to vector<8x512xbf16>
    %265 = arith.extf %264 : vector<8x512xbf16> to vector<8x512xf32>
    %266 = arith.addf %259, %265 : vector<8x512xf32>
    %267 = vector.extract_strided_slice %266 {offsets = [0, 0], sizes = [8, 128], strides = [1, 1]} : vector<8x512xf32> to vector<8x128xf32>
    %268 = arith.negf %267 : vector<8x128xf32>
    %269 = math.exp %268 : vector<8x128xf32>
    %cst_84 = arith.constant 1.000000e+00 : f32
    %270 = vector.broadcast %cst_84 : f32 to vector<8x128xf32>
    %271 = arith.addf %270, %269 : vector<8x128xf32>
    %272 = arith.divf %270, %271 : vector<8x128xf32>
    %273 = vector.extract_strided_slice %266 {offsets = [0, 128], sizes = [8, 128], strides = [1, 1]} : vector<8x512xf32> to vector<8x128xf32>
    %274 = arith.negf %273 : vector<8x128xf32>
    %275 = math.exp %274 : vector<8x128xf32>
    %cst_85 = arith.constant 1.000000e+00 : f32
    %276 = vector.broadcast %cst_85 : f32 to vector<8x128xf32>
    %277 = arith.addf %276, %275 : vector<8x128xf32>
    %278 = arith.divf %276, %277 : vector<8x128xf32>
    %279 = vector.extract_strided_slice %266 {offsets = [0, 256], sizes = [8, 128], strides = [1, 1]} : vector<8x512xf32> to vector<8x128xf32>
    %280 = math.tanh %279 : vector<8x128xf32>
    %281 = vector.extract_strided_slice %266 {offsets = [0, 384], sizes = [8, 128], strides = [1, 1]} : vector<8x512xf32> to vector<8x128xf32>
    %282 = arith.negf %281 : vector<8x128xf32>
    %283 = math.exp %282 : vector<8x128xf32>
    %cst_86 = arith.constant 1.000000e+00 : f32
    %284 = vector.broadcast %cst_86 : f32 to vector<8x128xf32>
    %285 = arith.addf %284, %283 : vector<8x128xf32>
    %286 = arith.divf %284, %285 : vector<8x128xf32>
    %287 = arith.mulf %278, %254 : vector<8x128xf32>
    %288 = arith.mulf %272, %280 : vector<8x128xf32>
    %289 = arith.addf %287, %288 : vector<8x128xf32>
    %290 = math.tanh %289 : vector<8x128xf32>
    %291 = arith.mulf %286, %290 : vector<8x128xf32>
    %c7_i32_87 = arith.constant 7 : i32
    %292 = arith.truncf %291 : vector<8x128xf32> to vector<8x128xbf16>
    %c0_88 = arith.constant 0 : index
    %c0_89 = arith.constant 0 : index
    %293 = vector.load %arg4[%c0_88, %c0_89] : memref<128x512xbf16, #tpu.memory_space<vmem>>, vector<128x512xbf16>
    %cst_90 = arith.constant dense<0.000000e+00> : vector<8x512xf32>
    %294 = tpu.matmul %292, %293, %cst_90 {dimension_numbers = #tpu.dot_dimension_numbers<[1], [0], [0], [1], [0, 0, 1, 1], [], []>} : vector<8x128xbf16>, vector<128x512xbf16>, vector<8x512xf32> -> vector<8x512xf32>
    %c1_i32_91 = arith.constant 1 : i32
    %295 = arith.addi %c7_i32_87, %c1_i32_91 : i32
    %c7_i32_92 = arith.constant 7 : i32
    %296 = arith.minsi %295, %c7_i32_92 : i32
    %297 = arith.index_cast %296 : i32 to index
    %c0_93 = arith.constant 0 : index
    %c0_94 = arith.constant 0 : index
    %298 = vector.load %arg8[%297, %c0_93, %c0_94] : memref<8x8x512xbf16, #tpu.memory_space<vmem>>, vector<1x8x512xbf16>
    %299 = vector.shape_cast %298 : vector<1x8x512xbf16> to vector<8x512xbf16>
    %300 = arith.extf %299 : vector<8x512xbf16> to vector<8x512xf32>
    %301 = arith.addf %294, %300 : vector<8x512xf32>
    %302 = vector.extract_strided_slice %301 {offsets = [0, 0], sizes = [8, 128], strides = [1, 1]} : vector<8x512xf32> to vector<8x128xf32>
    %303 = arith.negf %302 : vector<8x128xf32>
    %304 = math.exp %303 : vector<8x128xf32>
    %cst_95 = arith.constant 1.000000e+00 : f32
    %305 = vector.broadcast %cst_95 : f32 to vector<8x128xf32>
    %306 = arith.addf %305, %304 : vector<8x128xf32>
    %307 = arith.divf %305, %306 : vector<8x128xf32>
    %308 = vector.extract_strided_slice %301 {offsets = [0, 128], sizes = [8, 128], strides = [1, 1]} : vector<8x512xf32> to vector<8x128xf32>
    %309 = arith.negf %308 : vector<8x128xf32>
    %310 = math.exp %309 : vector<8x128xf32>
    %cst_96 = arith.constant 1.000000e+00 : f32
    %311 = vector.broadcast %cst_96 : f32 to vector<8x128xf32>
    %312 = arith.addf %311, %310 : vector<8x128xf32>
    %313 = arith.divf %311, %312 : vector<8x128xf32>
    %314 = vector.extract_strided_slice %301 {offsets = [0, 256], sizes = [8, 128], strides = [1, 1]} : vector<8x512xf32> to vector<8x128xf32>
    %315 = math.tanh %314 : vector<8x128xf32>
    %316 = vector.extract_strided_slice %301 {offsets = [0, 384], sizes = [8, 128], strides = [1, 1]} : vector<8x512xf32> to vector<8x128xf32>
    %317 = arith.negf %316 : vector<8x128xf32>
    %318 = math.exp %317 : vector<8x128xf32>
    %cst_97 = arith.constant 1.000000e+00 : f32
    %319 = vector.broadcast %cst_97 : f32 to vector<8x128xf32>
    %320 = arith.addf %319, %318 : vector<8x128xf32>
    %321 = arith.divf %319, %320 : vector<8x128xf32>
    %322 = arith.mulf %313, %289 : vector<8x128xf32>
    %323 = arith.mulf %307, %315 : vector<8x128xf32>
    %324 = arith.addf %322, %323 : vector<8x128xf32>
    %325 = math.tanh %324 : vector<8x128xf32>
    %326 = arith.mulf %321, %325 : vector<8x128xf32>
    %c8_i32 = arith.constant 8 : i32
    %327 = vector.extract_strided_slice %326 {offsets = [0, 64], sizes = [8, 64], strides = [1, 1]} : vector<8x128xf32> to vector<8x64xf32>
    %328 = arith.truncf %327 : vector<8x64xf32> to vector<8x64xbf16>
    %c0_98 = arith.constant 0 : index
    %c0_99 = arith.constant 0 : index
    %329 = vector.load %arg5[%c0_98, %c0_99] : memref<64x5xbf16, #tpu.memory_space<vmem>>, vector<64x5xbf16>
    %cst_100 = arith.constant dense<0.000000e+00> : vector<8x5xf32>
    %330 = tpu.matmul %328, %329, %cst_100 {dimension_numbers = #tpu.dot_dimension_numbers<[1], [0], [0], [1], [0, 0, 1, 1], [], []>} : vector<8x64xbf16>, vector<64x5xbf16>, vector<8x5xf32> -> vector<8x5xf32>
    %c0_101 = arith.constant 0 : index
    %c0_102 = arith.constant 0 : index
    %331 = vector.load %arg6[%c0_101, %c0_102] : memref<1x5xf32, #tpu.memory_space<vmem>>, vector<1x5xf32>
    %332 = vector.broadcast %331 : vector<1x5xf32> to vector<8x5xf32>
    %333 = arith.addf %330, %332 : vector<8x5xf32>
    %c0_103 = arith.constant 0 : index
    %c0_104 = arith.constant 0 : index
    %334 = vector.load %arg7[%c0_103, %c0_104] : memref<8x5xf32, #tpu.memory_space<vmem>>, vector<8x5xf32>
    tpu.vector_store %arg7[%c0_103, %c0_104], %333 {strides = array<i32>} : memref<8x5xf32, #tpu.memory_space<vmem>>, vector<8x5xf32>,
    return
  }
  func.func @transform_0(%arg0: i32) -> (i32, i32, i32) {
    %c0_i32 = arith.constant 0 : i32
    %c0_i32_0 = arith.constant 0 : i32
    %c0_i32_1 = arith.constant 0 : i32
    return %c0_i32, %arg0, %c0_i32_0 : i32, i32, i32
  }
  func.func @transform_1(%arg0: i32) -> (i32, i32) {
    %c0_i32 = arith.constant 0 : i32
    %c0_i32_0 = arith.constant 0 : i32
    return %arg0, %c0_i32 : i32, i32
  }
  func.func @transform_2(%arg0: i32) -> (i32, i32) {
    %c0_i32 = arith.constant 0 : i32
    %c0_i32_0 = arith.constant 0 : i32
    %c0_i32_1 = arith.constant 0 : i32
    return %c0_i32, %c0_i32_0 : i32, i32
  }
  func.func @transform_3(%arg0: i32) -> (i32, i32) {
    %c0_i32 = arith.constant 0 : i32
    %c0_i32_0 = arith.constant 0 : i32
    %c0_i32_1 = arith.constant 0 : i32
    return %c0_i32, %c0_i32_0 : i32, i32
  }
  func.func @transform_4(%arg0: i32) -> (i32, i32) {
    %c0_i32 = arith.constant 0 : i32
    %c0_i32_0 = arith.constant 0 : i32
    %c0_i32_1 = arith.constant 0 : i32
    return %c0_i32, %c0_i32_0 : i32, i32
  }
  func.func @transform_5(%arg0: i32) -> (i32, i32) {
    %c0_i32 = arith.constant 0 : i32
    %c0_i32_0 = arith.constant 0 : i32
    %c0_i32_1 = arith.constant 0 : i32
    return %c0_i32, %c0_i32_0 : i32, i32
  }
  func.func @transform_6(%arg0: i32) -> (i32, i32) {
    %c0_i32 = arith.constant 0 : i32
    %c0_i32_0 = arith.constant 0 : i32
    return %arg0, %c0_i32 : i32, i32
  }
}

</mosaic_0001>

<bundles_post_ra>
// kernel: lstm_model_forward.1
= control target key start
LH: loop header
LB: loop body
LE: loop exit
PB: predicated region body
PF: predicated region fallthrough
CT: control target
= control target key end

     0   :  { %vm85_vm0 = vcmask 1045504   ;;  %v2869_v1 = vmov 0   ;;  %vm72_vm1 = vcmask 97280   ;;  %vm2031_vm4 = vmmov 0   ;;  %s2862_s2 = inlined_call_operand.vmem [shape: bf16[12,512], index: 2, kind: input, shape index: {}]   ;;  %s2863_s0 = inlined_call_operand.vmem [shape: bf16[8,8,12], index: 0, kind: input, shape index: {}]   ;;  %s2864_s3 = inlined_call_operand.vmem [shape: bf16[128,512], index: 3, kind: input, shape index: {}]   ;;  %s2865_s1 = inlined_call_operand.vmem [shape: f32[8,512], index: 1, kind: input, shape index: {}]   ;;  %s2866_s4 = inlined_call_operand.vmem [shape: bf16[64,5], index: 4, kind: input, shape index: {}]   ;;  %s2867_s5 = inlined_call_operand.vmem [shape: f32[1,5], index: 5, kind: input, shape index: {}]   ;;  %s2868_s6 = inlined_call_operand.vmem [shape: f32[8,5], index: 6, kind: output, shape index: {}]  }
   0x1   :  { %v1791_v0 = vld [vmem:[%s2862_s2 + $0x4] ss:$16 sps:$4 sm:$0x3f]   ;;  %130 = vmatprep.mubr.bf16.mxu0 %v2869_v1  ;;  %203 = vmatprep.mubr.bf16.mxu1 %v2869_v1  ;;  %v1793_v2 = vld [vmem:[%s2862_s2] ss:$16 sps:$4 sm:$0x3f]  }
   0x2   :  { %v1794_v3 = vld [vmem:[%s2863_s0] sm:$0xff]   ;;  %1657 = vmatprep.subr.msk.bf16.mxu0 %vm85_vm0, %v1791_v0  ;;  %v87_v4 = vsel %vm85_vm0, %v1793_v2, 0  ;;  %v1795_v5 = vld [vmem:[%s2862_s2 + $0xc] ss:$16 sps:$4 sm:$0x3f]   ;;  %v1822_v24 = vld [vmem:[%s2863_s0 + $0x10] sm:$0xff]  }
   0x3   :  { %99 = vmatpush1.bf16.msra.mxu0 %v87_v4  ;;  %v1797_v6 = vld [vmem:[%s2862_s2 + $0x8] ss:$16 sps:$4 sm:$0x3f]   ;;  %1662 = vmatprep.subr.msk.bf16.mxu1 %vm85_vm0, %v1795_v5  ;;  %v2092_v8 = vld [vmem:[%s2864_s3 + $0x4] ss:$16 sps:$4 sm:$0xff]   ;;  %vm1599_vm5 = vcmask 523264  }
   0x4   :  { %v93_v7 = vsel %vm85_vm0, %v1797_v6, 0  ;;  %v2097_v9 = vld [vmem:[%s2864_s3] ss:$16 sps:$4 sm:$0xff]   ;;  %659 = vmatprep.subr.bf16.mxu0 %v2092_v8  ;;  %v2103_v10 = vld [vmem:[%s2864_s3 + $0xc] ss:$16 sps:$4 sm:$0xff]   ;;  %vm1643_vm6 = vcmask 39936  }
   0x5   :  { %172 = vmatpush1.bf16.msra.mxu1 %v93_v7  ;;  %v2108_v11 = vld [vmem:[%s2864_s3 + $0x8] ss:$16 sps:$4 sm:$0xff]   ;;  %v2115_v12 = vld [vmem:[%s2864_s3 + $0x24] ss:$16 sps:$4 sm:$0xff]   ;;  %v2120_v13 = vld [vmem:[%s2864_s3 + $0x2c] ss:$16 sps:$4 sm:$0xff]  }
   0x6   :  { %1658 = vmatmul.mubr.msk.bf16.vlgmr.msra.gmra.mrb[0].mxu0 %vm72_vm1, %v1794_v3  ;;  %700 = vmatprep.subr.bf16.mxu1 %v2103_v10  ;;  %v2126_v14 = vld [vmem:[%s2864_s3 + $0x20] ss:$16 sps:$4 sm:$0xff]   ;;  %v1809_v15 = vld [vmem:[%s2863_s0 + $0x8] sm:$0xff]   ;;  %v2144_v17 = vld [vmem:[%s2864_s3 + $0x44] ss:$16 sps:$4 sm:$0xff]  }
   0x7   :  { %140 = vmatprep.mubr.bf16.mxu0 %v2869_v1  ;;  %660 = vmatpush1.bf16.msra.mxu0 %v2097_v9  ;;  %v2134_v16 = vld [vmem:[%s2864_s3 + $0x28] ss:$16 sps:$4 sm:$0xff]   ;;  %v2149_v18 = vld [vmem:[%s2864_s3 + $0x4c] ss:$16 sps:$4 sm:$0xff]   ;;  %v2156_v19 = vld [vmem:[%s2864_s3 + $0x40] ss:$16 sps:$4 sm:$0xff]  }
   0x8   :  { %1663 = vmatmul.mubr.msk.bf16.vlgmr.msra.gmra.mrb[0].mxu1 %vm72_vm1, %v1794_v3  ;;  %661 = vmatprep.subr.bf16.mxu0 %v2115_v12  ;;  %v2161_v20 = vld [vmem:[%s2864_s3 + $0x48] ss:$16 sps:$4 sm:$0xff]   ;;  %v2170_v21 = vld [vmem:[%s2864_s3 + $0x64] ss:$16 sps:$4 sm:$0xff]   ;;  %v2175_v22 = vld [vmem:[%s2864_s3 + $0x6c] ss:$16 sps:$4 sm:$0xff]  }
   0x9   :  { %213 = vmatprep.mubr.bf16.mxu1 %v2869_v1  ;;  %701 = vmatpush1.bf16.msra.mxu1 %v2108_v11  ;;  %v2181_v23 = vld [vmem:[%s2864_s3 + $0x60] ss:$16 sps:$4 sm:$0xff]   ;;  %v2189_v25 = vld [vmem:[%s2864_s3 + $0x68] ss:$16 sps:$4 sm:$0xff]   ;;  %v2197_v26 = vld [vmem:[%s2864_s3 + $0x84] ss:$16 sps:$4 sm:$0xff]  }
   0xa   :  { %702 = vmatprep.subr.bf16.mxu1 %v2120_v13  ;;  %v2203_v27 = vld [vmem:[%s2864_s3 + $0x80] ss:$16 sps:$4 sm:$0xff]   ;;  %v2208_v28 = vld [vmem:[%s2864_s3 + $0x8c] ss:$16 sps:$4 sm:$0xff]   ;;  %v2214_v29 = vld [vmem:[%s2864_s3 + $0xa4] ss:$16 sps:$4 sm:$0xff]  }
   0xb   :  { %662 = vmatpush1.bf16.msra.mxu0 %v2126_v14  ;;  %v2222_v30 = vld [vmem:[%s2864_s3 + $0x88] ss:$16 sps:$4 sm:$0xff]   ;;  %v2229_v31 = vld [vmem:[%s2864_s3 + $0xac] ss:$16 sps:$4 sm:$0xff]   ;;  %v2235_v32 = vld [vmem:[%s2864_s3 + $0xa0] ss:$16 sps:$4 sm:$0xff]  }
   0xc   :  { %663 = vmatprep.subr.bf16.mxu0 %v2144_v17  ;;  %v1835_v33 = vld [vmem:[%s2863_s0 + $0x18] sm:$0xff]   ;;  %v2244_v34 = vld [vmem:[%s2864_s3 + $0xc4] ss:$16 sps:$4 sm:$0xff]   ;;  %v2263_v37 = vld [vmem:[%s2864_s3 + $0xc0] ss:$16 sps:$4 sm:$0xff]  }
   0xd   :  { %703 = vmatpush1.bf16.msra.mxu1 %v2134_v16  ;;  %v2250_v35 = vld [vmem:[%s2864_s3 + $0xa8] ss:$16 sps:$4 sm:$0xff]   ;;  %v2256_v36 = vld [vmem:[%s2864_s3 + $0xcc] ss:$16 sps:$4 sm:$0xff]   ;;  %v2270_v38 = vld [vmem:[%s2864_s3 + $0xe4] ss:$16 sps:$4 sm:$0xff]  }
   0xe   :  { %1659 = vmatmul.mubr.msk.bf16.gmra.mrb[4].mxu0 %vm72_vm1, %v1809_v15  ;;  %704 = vmatprep.subr.bf16.mxu1 %v2149_v18  ;;  %v2276_v39 = vld [vmem:[%s2864_s3 + $0xc8] ss:$16 sps:$4 sm:$0xff]   ;;  %v2283_v40 = vld [vmem:[%s2864_s3 + $0xec] ss:$16 sps:$4 sm:$0xff]   ;;  %v2290_v41 = vld [vmem:[%s2864_s3 + $0xe0] ss:$16 sps:$4 sm:$0xff]  }
   0xf   :  { %150 = vmatprep.mubr.bf16.mxu0 %v2869_v1  ;;  %664 = vmatpush1.bf16.msra.mxu0 %v2156_v19  ;;  %v2297_v42 = vld [vmem:[%s2864_s3 + $0xe8] ss:$16 sps:$4 sm:$0xff]   ;;  %v2307_v43 = vld [vmem:[%s2865_s1] sm:$0xff]  ;;  %v2318_v48 = vld [vmem:[%s2865_s1 + $0x10] sm:$0xff] }
  0x10   :  { %1664 = vmatmul.mubr.msk.bf16.gmra.mrb[4].mxu1 %vm72_vm1, %v1809_v15  ;;  %665 = vmatprep.subr.bf16.mxu0 %v2170_v21  ;;  %v2312_v44 = vld [vmem:[%s2865_s1 + $0x8] sm:$0xff]  ;;  %v2324_v51 = vld [vmem:[%s2865_s1 + $0x18] sm:$0xff] }
  0x11   :  { %223 = vmatprep.mubr.bf16.mxu1 %v2869_v1  ;;  %705 = vmatpush1.bf16.msra.mxu1 %v2161_v20 }
  0x12   :  { %706 = vmatprep.subr.bf16.mxu1 %v2175_v22 }
  0x13   :  { %666 = vmatpush1.bf16.msra.mxu0 %v2181_v23 }
  0x14   :  { %667 = vmatprep.subr.bf16.mxu0 %v2197_v26 }
  0x15   :  { %707 = vmatpush1.bf16.msra.mxu1 %v2189_v25 }
  0x16   :  { %1660 = vmatmul.mubr.msk.bf16.gmra.mrb[8].mxu0 %vm72_vm1, %v1822_v24  ;;  %708 = vmatprep.subr.bf16.mxu1 %v2208_v28 }
  0x17   :  { %160 = vmatprep.mubr.bf16.mxu0 %v2869_v1  ;;  %668 = vmatpush1.bf16.msra.mxu0 %v2203_v27 }
  0x18   :  { %1665 = vmatmul.mubr.msk.bf16.gmra.mrb[8].mxu1 %vm72_vm1, %v1822_v24  ;;  %669 = vmatprep.subr.bf16.mxu0 %v2214_v29 }
  0x19   :  { %233 = vmatprep.mubr.bf16.mxu1 %v2869_v1  ;;  %709 = vmatpush1.bf16.msra.mxu1 %v2222_v30 }
  0x1a   :  { %710 = vmatprep.subr.bf16.mxu1 %v2229_v31 }
  0x1b   :  { %670 = vmatpush1.bf16.msra.mxu0 %v2235_v32 }
  0x1c   :  { %671 = vmatprep.subr.bf16.mxu0 %v2244_v34 }
  0x1d   :  { %711 = vmatpush1.bf16.msra.mxu1 %v2250_v35 }
  0x1e   :  { %1661 = vmatmul.mubr.msk.bf16.gmra.mrb[12].mxu0 %vm72_vm1, %v1835_v33  ;;  %712 = vmatprep.subr.bf16.mxu1 %v2256_v36 }
  0x1f   :  { %691 = vmatprep.mubr.bf16.mxu0 %v2869_v1  ;;  %672 = vmatpush1.bf16.msra.mxu0 %v2263_v37 }
  0x20   :  { %1666 = vmatmul.mubr.msk.bf16.gmra.mrb[12].mxu1 %vm72_vm1, %v1835_v33  ;;  %673 = vmatprep.subr.bf16.mxu0 %v2270_v38 }
  0x21   :  { %732 = vmatprep.mubr.bf16.mxu1 %v2869_v1  ;;  %713 = vmatpush1.bf16.msra.mxu1 %v2276_v39 }
  0x22   :  { %714 = vmatprep.subr.bf16.mxu1 %v2283_v40 }
  0x23   :  { %674 = vmatpush1.bf16.msra.mxu0 %v2290_v41 }
  0x24   :  { %773 = vmatprep.subr.bf16.mxu0 %v2092_v8 }
  0x25   :  { %715 = vmatpush1.bf16.msra.mxu1 %v2297_v42 }
  0x26   :  { %814 = vmatprep.subr.bf16.mxu1 %v2103_v10 }
  0xd9   :  { %v132_v45 = vpop.f32.mrb[0].mxu0 }
  0xda   :  { %v248_v46 = vadd.f32 %v2307_v43, %v132_v45  ;;  %v134_v47 = vpop.f32.mrb[1].mxu0 }
  0xdb   :  { %v249_v49 = vadd.f32 %v2312_v44, %v134_v47  ;;  %v136_v50 = vpop.f32.mrb[2].mxu0  ;;  %v205_v54 = vpop.f32.mrb[0].mxu1 }
  0xdc   :  { %v252_v52 = vadd.f32 %v2307_v43, %v136_v50  ;;  %v138_v53 = vpop.f32.mrb[3].mxu0  ;;  %v250_v57 = vadd.f32 %v2318_v48, %v205_v54  ;;  %v207_v58 = vpop.f32.mrb[1].mxu1 }
  0xdd   :  { %v1754_v55 = vpack.c.bf16 %v249_v49, %v248_v46  ;;  %v253_v56 = vadd.f32 %v2312_v44, %v138_v53  ;;  %v251_v59 = vadd.f32 %v2324_v51, %v207_v58  ;;  %v209_v60 = vpop.f32.mrb[2].mxu1 }
  0xde   :  { %v254_v0 = vadd.f32 %v2318_v48, %v209_v60  ;;  %v211_v2 = vpop.f32.mrb[3].mxu1 }
  0xdf   :  { %v426_v61 = vunpack.c.l.bf16 %v1754_v55  ;;  %v427_v62 = vunpack.c.h.bf16 %v1754_v55  ;;  %v2330_v63 = vpack.c.bf16 %v253_v56, %v252_v52  ;;  %v1755_v3 = vpack.c.bf16 %v251_v59, %v250_v57 }
  0xe0   :  { %v255_v4 = vadd.f32 %v2324_v51, %v211_v2  ;;  %v454_v59 = vlaneseq }
  0xe1   :  { %v1683_v5 = vmul.f32 -1.442695, %v426_v61  ;;  %v1684_v6 = vmul.f32 -1.442695, %v427_v62  ;;  %v429_v15 = vunpack.c.h.bf16 %v1755_v3  ;;  %v428_v33 = vunpack.c.l.bf16 %v1755_v3 }
  0xe2   :  { %v2334_v7 = vpack.c.bf16 %v255_v4, %v254_v0  ;;  %v2339_v60 = vand.u32 127, %v454_v59  ;;  %v142_v4 = vpop.f32.mrb[4].mxu0 }
  0xe3   :  { %1853 = vpow2.f32 %v1683_v5  ;;  %v1685_v24 = vmul.f32 -1.442695, %v429_v15  ;;  %v215_v3 = vpop.f32.mrb[4].mxu1  ;;  %v256_v15 = vadd.f32 %v2307_v43, %v142_v4 }
  0xe4   :  { %1855 = vpow2.f32 %v1684_v6  ;;  %vm456_vm2 = vcmp.lt.s32.totalorder %v2339_v60, 64  ;;  %v258_v5 = vadd.f32 %v2318_v48, %v215_v3  ;;  %v217_v6 = vpop.f32.mrb[5].mxu1 }
  0xe5   :  { %1857 = vpow2.f32 %v1685_v24  ;;  %vm1718_vm3 = vmpackc.low %vm456_vm2, %vm456_vm2  ;;  %v144_v24 = vpop.f32.mrb[5].mxu0 }
  0xe6   :  { %1859 = vtanh.f32 %v428_v33  ;;  %v259_v33 = vadd.f32 %v2324_v51, %v217_v6 }
  0xed   :  { %v1854_v45 = vpop.eup %1853 }
  0xee   :  { %v1856_v46 = vpop.eup %1855  ;;  %v433_v47 = vadd.f32 1.0, %v1854_v45  ;;  %v219_v45 = vpop.f32.mrb[6].mxu1 }
  0xef   :  { %v439_v49 = vadd.f32 1.0, %v1856_v46  ;;  %v1858_v50 = vpop.eup %1857  ;;  %v257_v46 = vadd.f32 %v2312_v44, %v144_v24 }
  0xf0   :  { %1861 = vrcp.f32 %v433_v47  ;;  %v1860_v52 = vpop.eup %1859  ;;  %v446_v54 = vadd.f32 1.0, %v1858_v50  ;;  %v146_v47 = vpop.f32.mrb[6].mxu0 }
  0xf1   :  { %1863 = vrcp.f32 %v439_v49  ;;  %v262_v49 = vadd.f32 %v2318_v48, %v219_v45  ;;  %v221_v50 = vpop.f32.mrb[7].mxu1 }
  0xf2   :  { %1865 = vrcp.f32 %v446_v54  ;;  %v2385_v54 = vpack.c.bf16 %v259_v33, %v258_v5 }
  0xfa   :  { %v1862_v53 = vpop.eup %1861 }
  0xfb   :  { %v1864_v55 = vpop.eup %1863  ;;  %v450_v56 = vmul.f32 %v1862_v53, %v1860_v52  ;;  %v260_v52 = vadd.f32 %v2307_v43, %v146_v47  ;;  %v148_v53 = vpop.f32.mrb[7].mxu0 }
  0xfc   :  { %v449_v57 = vmul.f32 0.0, %v1864_v55  ;;  %v1866_v61 = vpop.eup %1865  ;;  %v263_v55 = vadd.f32 %v2324_v51, %v221_v50 }
  0xfe   :  { %v2336_v58 = vadd.f32 %v450_v56, %v449_v57  ;;  %v2388_v56 = vpack.c.bf16 %v257_v46, %v256_v15  ;;  %v261_v57 = vadd.f32 %v2312_v44, %v148_v53  ;;  %v2391_v59 = vpack.c.bf16 %v263_v55, %v262_v49 }
 0x100   :  { %1867 = vtanh.f32 %v2336_v58  ;;  %v769_v60 = vunpack.c.l.bf16 %v2388_v56 }
 0x10a   :  { %v1868_v62 = vpop.eup %1867 }
 0x10b   :  { %v453_v0 = vmul.f32 %v1868_v62, %v1866_v61  ;;  %v2393_v61 = vpack.c.bf16 %v261_v57, %v260_v52  ;;  %v225_v62 = vpop.f32.mrb[8].mxu1 }
 0x10c   :  { %v227_v3 = vpop.f32.mrb[9].mxu1 }
 0x10d   :  { %v1719_v2 = vpack.c.bf16 %v453_v0, %v453_v0  ;;  %v152_v0 = vpop.f32.mrb[8].mxu0  ;;  %v267_v5 = vadd.f32 %v2324_v51, %v227_v3  ;;  %v229_v24 = vpop.f32.mrb[10].mxu1 }
 0x10e   :  { %v264_v4 = vadd.f32 %v2307_v43, %v152_v0  ;;  %v154_v6 = vpop.f32.mrb[9].mxu0  ;;  %v270_v45 = vadd.f32 %v2318_v48, %v229_v24  ;;  %v231_v46 = vpop.f32.mrb[11].mxu1 }
 0x10f   :  { %1720 = vmatmul.mubr.msk.bf16.vlgmr.msra.gmra.mrb[16].mxu0 %vm1718_vm3, %v1719_v2  ;;  %1723 = vmatmul.mubr.msk.bf16.vlgmr.msra.gmra.mrb[16].mxu1 %vm1718_vm3, %v1719_v2  ;;  %v266_v2 = vadd.f32 %v2318_v48, %v225_v62  ;;  %v265_v15 = vadd.f32 %v2312_v44, %v154_v6  ;;  %v156_v33 = vpop.f32.mrb[10].mxu0  ;;  %v271_v52 = vadd.f32 %v2324_v51, %v231_v46  ;;  %v235_v0 = vpop.f32.mrb[12].mxu1 }
 0x110   :  { %774 = vmatpush1.bf16.msra.mxu0 %v2097_v9  ;;  %815 = vmatpush1.bf16.msra.mxu1 %v2108_v11  ;;  %v268_v47 = vadd.f32 %v2307_v43, %v156_v33  ;;  %v158_v49 = vpop.f32.mrb[11].mxu0  ;;  %v274_v6 = vadd.f32 %v2318_v48, %v235_v0  ;;  %v237_v24 = vpop.f32.mrb[13].mxu1 }
 0x111   :  { %775 = vmatprep.subr.bf16.mxu0 %v2115_v12  ;;  %816 = vmatprep.subr.bf16.mxu1 %v2120_v13  ;;  %v2401_v50 = vpack.c.bf16 %v267_v5, %v266_v2  ;;  %v2404_v53 = vpack.c.bf16 %v265_v15, %v264_v4  ;;  %v269_v55 = vadd.f32 %v2312_v44, %v158_v49  ;;  %v162_v3 = vpop.f32.mrb[12].mxu0  ;;  %v239_v5 = vpop.f32.mrb[14].mxu1 }
 0x112   :  { %805 = vmatprep.mubr.bf16.mxu0 %v2869_v1  ;;  %846 = vmatprep.mubr.bf16.mxu1 %v2869_v1  ;;  %v2407_v57 = vpack.c.bf16 %v271_v52, %v270_v45  ;;  %v272_v33 = vadd.f32 %v2307_v43, %v162_v3  ;;  %v164_v1 = vpop.f32.mrb[13].mxu0  ;;  %v275_v2 = vadd.f32 %v2324_v51, %v237_v24  ;;  %v241_v45 = vpop.f32.mrb[15].mxu1 }
 0x113   :  { %v2409_v62 = vpack.c.bf16 %v269_v55, %v268_v47  ;;  %v273_v4 = vadd.f32 %v2312_v44, %v164_v1  ;;  %v166_v15 = vpop.f32.mrb[14].mxu0  ;;  %v278_v46 = vadd.f32 %v2318_v48, %v239_v5  ;;  %v279_v55 = vadd.f32 %v2324_v51, %v241_v45 }
 0x114   :  { %776 = vmatpush1.bf16.msra.mxu0 %v2126_v14  ;;  %817 = vmatpush1.bf16.msra.mxu1 %v2134_v16  ;;  %2876 = vst [vmem:[#allocation3_spill] sm:$0xff] %v2407_v57  ;;  %v276_v47 = vadd.f32 %v2307_v43, %v166_v15  ;;  %v168_v49 = vpop.f32.mrb[15].mxu0  ;;  %v2417_v52 = vpack.c.bf16 %v275_v2, %v274_v6  ;;  %v495_v1 = vunpack.c.l.bf16 %v2330_v63  ;;  %v497_v48 = vunpack.c.l.bf16 %v2334_v7 }
 0x115   :  { %777 = vmatprep.subr.bf16.mxu0 %v2144_v17  ;;  %818 = vmatprep.subr.bf16.mxu1 %v2149_v18  ;;  %2877 = vst [vmem:[#allocation4_spill] sm:$0xff] %v2409_v62  ;;  %v2420_v0 = vpack.c.bf16 %v273_v4, %v272_v33  ;;  %v277_v3 = vadd.f32 %v2312_v44, %v168_v49  ;;  %v496_v43 = vunpack.c.h.bf16 %v2330_v63  ;;  %v498_v6 = vunpack.c.h.bf16 %v2334_v7 }
 0x116   :  { %2878 = vst [vmem:[#allocation5_spill] sm:$0xff] %v2417_v52  ;;  %v2423_v57 = vpack.c.bf16 %v279_v55, %v278_v46 }
 0x117   :  { %v2425_v24 = vpack.c.bf16 %v277_v3, %v276_v47 }
 0x118   :  { %778 = vmatpush1.bf16.msra.mxu0 %v2156_v19  ;;  %819 = vmatpush1.bf16.msra.mxu1 %v2161_v20  ;;  %2879 = vst [vmem:[#allocation6_spill] sm:$0xff] %v2423_v57 }
 0x119   :  { %779 = vmatprep.subr.bf16.mxu0 %v2170_v21  ;;  %820 = vmatprep.subr.bf16.mxu1 %v2175_v22  ;;  %2880 = vst [vmem:[#allocation7_spill] sm:$0xff] %v2425_v24 }
 0x11c   :  { %780 = vmatpush1.bf16.msra.mxu0 %v2181_v23  ;;  %821 = vmatpush1.bf16.msra.mxu1 %v2189_v25 }
 0x11d   :  { %781 = vmatprep.subr.bf16.mxu0 %v2197_v26  ;;  %822 = vmatprep.subr.bf16.mxu1 %v2208_v28 }
 0x120   :  { %782 = vmatpush1.bf16.msra.mxu0 %v2203_v27  ;;  %823 = vmatpush1.bf16.msra.mxu1 %v2222_v30 }
 0x121   :  { %783 = vmatprep.subr.bf16.mxu0 %v2214_v29  ;;  %824 = vmatprep.subr.bf16.mxu1 %v2229_v31 }
 0x124   :  { %784 = vmatpush1.bf16.msra.mxu0 %v2235_v32  ;;  %825 = vmatpush1.bf16.msra.mxu1 %v2250_v35 }
 0x125   :  { %785 = vmatprep.subr.bf16.mxu0 %v2244_v34  ;;  %826 = vmatprep.subr.bf16.mxu1 %v2256_v36 }
 0x128   :  { %786 = vmatpush1.bf16.msra.mxu0 %v2263_v37  ;;  %827 = vmatpush1.bf16.msra.mxu1 %v2276_v39 }
 0x129   :  { %787 = vmatprep.subr.bf16.mxu0 %v2270_v38  ;;  %828 = vmatprep.subr.bf16.mxu1 %v2283_v40 }
 0x12c   :  { %788 = vmatpush1.bf16.msra.mxu0 %v2290_v41  ;;  %829 = vmatpush1.bf16.msra.mxu1 %v2297_v42 }
 0x12d   :  { %887 = vmatprep.subr.bf16.mxu0 %v2092_v8  ;;  %928 = vmatprep.subr.bf16.mxu1 %v2103_v10 }
 0x1e2   :  { %v693_v5 = vpop.f32.mrb[16].mxu0  ;;  %v734_v62 = vpop.f32.mrb[16].mxu1 }
 0x1e3   :  { %v694_v2 = vadd.f32 %v693_v5, %v495_v1  ;;  %v735_v51 = vadd.f32 %v734_v62, %v497_v48  ;;  %v695_v33 = vpop.f32.mrb[17].mxu0  ;;  %v736_v4 = vpop.f32.mrb[17].mxu1 }
 0x1e4   :  { %v696_v15 = vadd.f32 %v695_v33, %v496_v43  ;;  %v737_v44 = vadd.f32 %v736_v4, %v498_v6  ;;  %v697_v46 = vpop.f32.mrb[18].mxu0  ;;  %v738_v45 = vpop.f32.mrb[18].mxu1  ;;  %v458_v43 = vsel %vm456_vm2, %v2336_v58, 0.0  ;;  %v2881_v58 = vmov 0  }
 0x1e5   :  { %v1724_v47 = vmul.f32 -1.442695, %v694_v2  ;;  %v698_v49 = vpop.f32.mrb[19].mxu0  ;;  %v739_v55 = vpop.f32.mrb[19].mxu1  ;;  %v770_v45 = vunpack.c.h.bf16 %v2388_v56 }
 0x1e6   :  { %v1725_v3 = vmul.f32 -1.442695, %v696_v15  ;;  %v1726_v57 = vmul.f32 -1.442695, %v737_v44  ;;  %v771_v15 = vunpack.c.l.bf16 %v2385_v54 }
 0x1e7   :  { %1869 = vpow2.f32 %v1724_v47  ;;  %v772_v47 = vunpack.c.h.bf16 %v2385_v54 }
 0x1e8   :  { %1871 = vpow2.f32 %v1725_v3 }
 0x1e9   :  { %1873 = vpow2.f32 %v1726_v57 }
 0x1ea   :  { %1875 = vtanh.f32 %v735_v51 }
 0x1f1   :  { %v1870_v24 = vpop.eup %1869 }
 0x1f2   :  { %v1872_v52 = vpop.eup %1871  ;;  %v744_v63 = vadd.f32 1.0, %v1870_v24 }
 0x1f3   :  { %v750_v7 = vadd.f32 1.0, %v1872_v52  ;;  %v1874_v62 = vpop.eup %1873 }
 0x1f4   :  { %1877 = vrcp.f32 %v744_v63  ;;  %v1876_v1 = vpop.eup %1875  ;;  %v757_v2 = vadd.f32 1.0, %v1874_v62 }
 0x1f5   :  { %1879 = vrcp.f32 %v750_v7 }
 0x1f6   :  { %1881 = vrcp.f32 %v757_v2 }
 0x1fe   :  { %v1878_v48 = vpop.eup %1877 }
 0x1ff   :  { %v1880_v5 = vpop.eup %1879  ;;  %v761_v6 = vmul.f32 %v1878_v48, %v1876_v1 }
 0x200   :  { %v760_v33 = vmul.f32 %v1880_v5, %v458_v43  ;;  %v1882_v57 = vpop.eup %1881 }
 0x202   :  { %v2434_v4 = vadd.f32 %v761_v6, %v760_v33 }
 0x204   :  { %1883 = vtanh.f32 %v2434_v4 }
 0x20e   :  { %v1884_v52 = vpop.eup %1883 }
 0x20f   :  { %v764_v24 = vmul.f32 %v1884_v52, %v1882_v57 }
 0x211   :  { %v765_v51 = vpack.c.bf16 %v764_v24, %v764_v24 }
 0x213   :  { %806 = vmatmul.mubr.bf16.vlgmr.msra.gmra.mrb[20].mxu0 %v765_v51  ;;  %847 = vmatmul.mubr.bf16.vlgmr.msra.gmra.mrb[20].mxu1 %v765_v51 }
 0x214   :  { %888 = vmatpush1.bf16.msra.mxu0 %v2097_v9  ;;  %929 = vmatpush1.bf16.msra.mxu1 %v2108_v11 }
 0x215   :  { %889 = vmatprep.subr.bf16.mxu0 %v2115_v12  ;;  %930 = vmatprep.subr.bf16.mxu1 %v2120_v13 }
 0x216   :  { %919 = vmatprep.mubr.bf16.mxu0 %v2881_v58  ;;  %960 = vmatprep.mubr.bf16.mxu1 %v2881_v58 }
 0x218   :  { %890 = vmatpush1.bf16.msra.mxu0 %v2126_v14  ;;  %931 = vmatpush1.bf16.msra.mxu1 %v2134_v16 }
 0x219   :  { %891 = vmatprep.subr.bf16.mxu0 %v2144_v17  ;;  %932 = vmatprep.subr.bf16.mxu1 %v2149_v18 }
 0x21c   :  { %892 = vmatpush1.bf16.msra.mxu0 %v2156_v19  ;;  %933 = vmatpush1.bf16.msra.mxu1 %v2161_v20 }
 0x21d   :  { %893 = vmatprep.subr.bf16.mxu0 %v2170_v21  ;;  %934 = vmatprep.subr.bf16.mxu1 %v2175_v22 }
 0x220   :  { %894 = vmatpush1.bf16.msra.mxu0 %v2181_v23  ;;  %935 = vmatpush1.bf16.msra.mxu1 %v2189_v25 }
 0x221   :  { %895 = vmatprep.subr.bf16.mxu0 %v2197_v26  ;;  %936 = vmatprep.subr.bf16.mxu1 %v2208_v28 }
 0x224   :  { %896 = vmatpush1.bf16.msra.mxu0 %v2203_v27  ;;  %937 = vmatpush1.bf16.msra.mxu1 %v2222_v30 }
 0x225   :  { %897 = vmatprep.subr.bf16.mxu0 %v2214_v29  ;;  %938 = vmatprep.subr.bf16.mxu1 %v2229_v31 }
 0x228   :  { %898 = vmatpush1.bf16.msra.mxu0 %v2235_v32  ;;  %939 = vmatpush1.bf16.msra.mxu1 %v2250_v35 }
 0x229   :  { %899 = vmatprep.subr.bf16.mxu0 %v2244_v34  ;;  %940 = vmatprep.subr.bf16.mxu1 %v2256_v36 }
 0x22c   :  { %900 = vmatpush1.bf16.msra.mxu0 %v2263_v37  ;;  %941 = vmatpush1.bf16.msra.mxu1 %v2276_v39 }
 0x22d   :  { %901 = vmatprep.subr.bf16.mxu0 %v2270_v38  ;;  %942 = vmatprep.subr.bf16.mxu1 %v2283_v40 }
 0x230   :  { %902 = vmatpush1.bf16.msra.mxu0 %v2290_v41  ;;  %943 = vmatpush1.bf16.msra.mxu1 %v2297_v42 }
 0x231   :  { %1001 = vmatprep.subr.bf16.mxu0 %v2092_v8  ;;  %1042 = vmatprep.subr.bf16.mxu1 %v2103_v10 }
 0x2e6   :  { %v807_v44 = vpop.f32.mrb[20].mxu0  ;;  %v848_v46 = vpop.f32.mrb[20].mxu1 }
 0x2e7   :  { %v808_v49 = vadd.f32 %v807_v44, %v769_v60  ;;  %v849_v55 = vadd.f32 %v848_v46, %v771_v15  ;;  %v809_v3 = vpop.f32.mrb[21].mxu0  ;;  %v850_v63 = vpop.f32.mrb[21].mxu1 }
 0x2e8   :  { %v810_v7 = vadd.f32 %v809_v3, %v770_v45  ;;  %v851_v62 = vadd.f32 %v850_v63, %v772_v47  ;;  %v811_v1 = vpop.f32.mrb[22].mxu0  ;;  %v852_v48 = vpop.f32.mrb[22].mxu1 }
 0x2e9   :  { %v1727_v5 = vmul.f32 -1.442695, %v808_v49  ;;  %v812_v43 = vpop.f32.mrb[23].mxu0  ;;  %v853_v6 = vpop.f32.mrb[23].mxu1  ;;  %v884_v48 = vunpack.c.h.bf16 %v2393_v61 }
 0x2ea   :  { %v1728_v2 = vmul.f32 -1.442695, %v810_v7  ;;  %v1729_v33 = vmul.f32 -1.442695, %v851_v62  ;;  %v885_v7 = vunpack.c.l.bf16 %v2391_v59 }
 0x2eb   :  { %1885 = vpow2.f32 %v1727_v5  ;;  %v886_v5 = vunpack.c.h.bf16 %v2391_v59 }
 0x2ec   :  { %1887 = vpow2.f32 %v1728_v2 }
 0x2ed   :  { %1889 = vpow2.f32 %v1729_v33 }
 0x2ee   :  { %1891 = vtanh.f32 %v849_v55 }
 0x2f5   :  { %v1886_v57 = vpop.eup %1885 }
 0x2f6   :  { %v1888_v52 = vpop.eup %1887  ;;  %v858_v56 = vadd.f32 1.0, %v1886_v57 }
 0x2f7   :  { %v864_v54 = vadd.f32 1.0, %v1888_v52  ;;  %v1890_v24 = vpop.eup %1889 }
 0x2f8   :  { %1893 = vrcp.f32 %v858_v56  ;;  %v1892_v51 = vpop.eup %1891  ;;  %v871_v46 = vadd.f32 1.0, %v1890_v24 }
 0x2f9   :  { %1895 = vrcp.f32 %v864_v54 }
 0x2fa   :  { %1897 = vrcp.f32 %v871_v46 }
 0x302   :  { %v1894_v60 = vpop.eup %1893 }
 0x303   :  { %v1896_v15 = vpop.eup %1895  ;;  %v875_v44 = vmul.f32 %v1894_v60, %v1892_v51 }
 0x304   :  { %v874_v45 = vmul.f32 %v1896_v15, %v2434_v4  ;;  %v1898_v49 = vpop.eup %1897  ;;  %v883_v4 = vunpack.c.l.bf16 %v2393_v61 }
 0x306   :  { %v2476_v47 = vadd.f32 %v875_v44, %v874_v45 }
 0x308   :  { %1899 = vtanh.f32 %v2476_v47 }
 0x312   :  { %v1900_v3 = vpop.eup %1899 }
 0x313   :  { %v878_v63 = vmul.f32 %v1900_v3, %v1898_v49 }
 0x315   :  { %v879_v55 = vpack.c.bf16 %v878_v63, %v878_v63 }
 0x317   :  { %920 = vmatmul.mubr.bf16.vlgmr.msra.gmra.mrb[24].mxu0 %v879_v55  ;;  %961 = vmatmul.mubr.bf16.vlgmr.msra.gmra.mrb[24].mxu1 %v879_v55 }
 0x318   :  { %1002 = vmatpush1.bf16.msra.mxu0 %v2097_v9  ;;  %1043 = vmatpush1.bf16.msra.mxu1 %v2108_v11 }
 0x319   :  { %1003 = vmatprep.subr.bf16.mxu0 %v2115_v12  ;;  %1044 = vmatprep.subr.bf16.mxu1 %v2120_v13 }
 0x31a   :  { %1033 = vmatprep.mubr.bf16.mxu0 %v2881_v58  ;;  %1074 = vmatprep.mubr.bf16.mxu1 %v2881_v58 }
 0x31c   :  { %1004 = vmatpush1.bf16.msra.mxu0 %v2126_v14  ;;  %1045 = vmatpush1.bf16.msra.mxu1 %v2134_v16 }
 0x31d   :  { %1005 = vmatprep.subr.bf16.mxu0 %v2144_v17  ;;  %1046 = vmatprep.subr.bf16.mxu1 %v2149_v18 }
 0x320   :  { %1006 = vmatpush1.bf16.msra.mxu0 %v2156_v19  ;;  %1047 = vmatpush1.bf16.msra.mxu1 %v2161_v20 }
 0x321   :  { %1007 = vmatprep.subr.bf16.mxu0 %v2170_v21  ;;  %1048 = vmatprep.subr.bf16.mxu1 %v2175_v22 }
 0x324   :  { %1008 = vmatpush1.bf16.msra.mxu0 %v2181_v23  ;;  %1049 = vmatpush1.bf16.msra.mxu1 %v2189_v25 }
 0x325   :  { %1009 = vmatprep.subr.bf16.mxu0 %v2197_v26  ;;  %1050 = vmatprep.subr.bf16.mxu1 %v2208_v28 }
 0x328   :  { %1010 = vmatpush1.bf16.msra.mxu0 %v2203_v27  ;;  %1051 = vmatpush1.bf16.msra.mxu1 %v2222_v30 }
 0x329   :  { %1011 = vmatprep.subr.bf16.mxu0 %v2214_v29  ;;  %1052 = vmatprep.subr.bf16.mxu1 %v2229_v31 }
 0x32c   :  { %1012 = vmatpush1.bf16.msra.mxu0 %v2235_v32  ;;  %1053 = vmatpush1.bf16.msra.mxu1 %v2250_v35 }
 0x32d   :  { %1013 = vmatprep.subr.bf16.mxu0 %v2244_v34  ;;  %1054 = vmatprep.subr.bf16.mxu1 %v2256_v36 }
 0x330   :  { %1014 = vmatpush1.bf16.msra.mxu0 %v2263_v37  ;;  %1055 = vmatpush1.bf16.msra.mxu1 %v2276_v39 }
 0x331   :  { %1015 = vmatprep.subr.bf16.mxu0 %v2270_v38  ;;  %1056 = vmatprep.subr.bf16.mxu1 %v2283_v40 }
 0x334   :  { %1016 = vmatpush1.bf16.msra.mxu0 %v2290_v41  ;;  %1057 = vmatpush1.bf16.msra.mxu1 %v2297_v42 }
 0x335   :  { %1115 = vmatprep.subr.bf16.mxu0 %v2092_v8  ;;  %1156 = vmatprep.subr.bf16.mxu1 %v2103_v10 }
 0x3ea   :  { %v921_v62 = vpop.f32.mrb[24].mxu0  ;;  %v962_v1 = vpop.f32.mrb[24].mxu1 }
 0x3eb   :  { %v922_v43 = vadd.f32 %v921_v62, %v883_v4  ;;  %v963_v6 = vadd.f32 %v962_v1, %v885_v7  ;;  %v923_v2 = vpop.f32.mrb[25].mxu0  ;;  %v964_v33 = vpop.f32.mrb[25].mxu1 }
 0x3ec   :  { %v924_v57 = vadd.f32 %v923_v2, %v884_v48  ;;  %v965_v52 = vadd.f32 %v964_v33, %v886_v5  ;;  %v925_v56 = vpop.f32.mrb[26].mxu0  ;;  %v966_v54 = vpop.f32.mrb[26].mxu1 }
 0x3ed   :  { %v1730_v24 = vmul.f32 -1.442695, %v922_v43  ;;  %v926_v51 = vpop.f32.mrb[27].mxu0  ;;  %v967_v60 = vpop.f32.mrb[27].mxu1 }
 0x3ee   :  { %v1731_v15 = vmul.f32 -1.442695, %v924_v57  ;;  %v1732_v44 = vmul.f32 -1.442695, %v965_v52 }
 0x3ef   :  { %1901 = vpow2.f32 %v1730_v24 }
 0x3f0   :  { %1903 = vpow2.f32 %v1731_v15 }
 0x3f1   :  { %1905 = vpow2.f32 %v1732_v44 }
 0x3f2   :  { %1907 = vtanh.f32 %v963_v6 }
 0x3f9   :  { %v1902_v46 = vpop.eup %1901 }
 0x3fa   :  { %v1904_v45 = vpop.eup %1903  ;;  %v972_v61 = vadd.f32 1.0, %v1902_v46 }
 0x3fb   :  { %v978_v59 = vadd.f32 1.0, %v1904_v45  ;;  %v1906_v49 = vpop.eup %1905 }
 0x3fc   :  { %1909 = vrcp.f32 %v972_v61  ;;  %v1908_v3 = vpop.eup %1907  ;;  %v985_v7 = vadd.f32 1.0, %v1906_v49 }
 0x3fd   :  { %1911 = vrcp.f32 %v978_v59 }
 0x3fe   :  { %1913 = vrcp.f32 %v985_v7  ;;  %v2578_v7 = vld [vmem:[%s2864_s3 + $0x24] ss:$16 sps:$4 sm:$0xff]  }
 0x406   :  { %v1910_v63 = vpop.eup %1909 }
 0x407   :  { %v1912_v55 = vpop.eup %1911  ;;  %v989_v4 = vmul.f32 %v1910_v63, %v1908_v3 }
 0x408   :  { %v988_v62 = vmul.f32 %v1912_v55, %v2476_v47  ;;  %v1914_v48 = vpop.eup %1913  ;;  %v2566_v55 = vld [vmem:[%s2864_s3] ss:$16 sps:$4 sm:$0xff]  }
 0x40a   :  { %v2518_v1 = vadd.f32 %v989_v4, %v988_v62  ;;  %v2572_v4 = vld [vmem:[%s2864_s3 + $0x8] ss:$16 sps:$4 sm:$0xff]   ;;  %v2584_v62 = vld [vmem:[%s2864_s3 + $0x2c] ss:$16 sps:$4 sm:$0xff]  }
 0x40c   :  { %1915 = vtanh.f32 %v2518_v1 }
 0x416   :  { %v1916_v5 = vpop.eup %1915 }
 0x417   :  { %v992_v43 = vmul.f32 %v1916_v5, %v1914_v48  ;;  %v2598_v48 = vld [vmem:[%s2864_s3 + $0x28] ss:$16 sps:$4 sm:$0xff]   ;;  %v2604_v5 = vld [vmem:[%s2864_s3 + $0x44] ss:$16 sps:$4 sm:$0xff]  }
 0x419   :  { %v993_v6 = vpack.c.bf16 %v992_v43, %v992_v43  ;;  %v2610_v43 = vld [vmem:[%s2864_s3 + $0x4c] ss:$16 sps:$4 sm:$0xff]  }
 0x41b   :  { %1034 = vmatmul.mubr.bf16.vlgmr.msra.gmra.mrb[28].mxu0 %v993_v6  ;;  %1075 = vmatmul.mubr.bf16.vlgmr.msra.gmra.mrb[28].mxu1 %v993_v6  ;;  %v2616_v6 = vld [vmem:[%s2864_s3 + $0x40] ss:$16 sps:$4 sm:$0xff]  }
 0x41c   :  { %1116 = vmatpush1.bf16.msra.mxu0 %v2097_v9  ;;  %1157 = vmatpush1.bf16.msra.mxu1 %v2108_v11  ;;  %v997_v9 = vunpack.c.l.bf16 %v2404_v53  ;;  %v999_v11 = vunpack.c.l.bf16 %v2401_v50 }
 0x41d   :  { %1117 = vmatprep.subr.bf16.mxu0 %v2115_v12  ;;  %1158 = vmatprep.subr.bf16.mxu1 %v2120_v13 }
 0x41e   :  { %1147 = vmatprep.mubr.bf16.mxu0 %v2881_v58  ;;  %1188 = vmatprep.mubr.bf16.mxu1 %v2881_v58 }
 0x420   :  { %1118 = vmatpush1.bf16.msra.mxu0 %v2126_v14  ;;  %1159 = vmatpush1.bf16.msra.mxu1 %v2134_v16  ;;  %v998_v14 = vunpack.c.h.bf16 %v2404_v53  ;;  %v1000_v16 = vunpack.c.h.bf16 %v2401_v50 }
 0x421   :  { %1119 = vmatprep.subr.bf16.mxu0 %v2144_v17  ;;  %1160 = vmatprep.subr.bf16.mxu1 %v2149_v18 }
 0x424   :  { %1120 = vmatpush1.bf16.msra.mxu0 %v2156_v19  ;;  %1161 = vmatpush1.bf16.msra.mxu1 %v2161_v20 }
 0x425   :  { %1121 = vmatprep.subr.bf16.mxu0 %v2170_v21  ;;  %1162 = vmatprep.subr.bf16.mxu1 %v2175_v22 }
 0x428   :  { %1122 = vmatpush1.bf16.msra.mxu0 %v2181_v23  ;;  %1163 = vmatpush1.bf16.msra.mxu1 %v2189_v25 }
 0x429   :  { %1123 = vmatprep.subr.bf16.mxu0 %v2197_v26  ;;  %1164 = vmatprep.subr.bf16.mxu1 %v2208_v28 }
 0x42c   :  { %1124 = vmatpush1.bf16.msra.mxu0 %v2203_v27  ;;  %1165 = vmatpush1.bf16.msra.mxu1 %v2222_v30 }
 0x42d   :  { %1125 = vmatprep.subr.bf16.mxu0 %v2214_v29  ;;  %1166 = vmatprep.subr.bf16.mxu1 %v2229_v31 }
 0x430   :  { %1126 = vmatpush1.bf16.msra.mxu0 %v2235_v32  ;;  %1167 = vmatpush1.bf16.msra.mxu1 %v2250_v35 }
 0x431   :  { %1127 = vmatprep.subr.bf16.mxu0 %v2244_v34  ;;  %1168 = vmatprep.subr.bf16.mxu1 %v2256_v36 }
 0x434   :  { %1128 = vmatpush1.bf16.msra.mxu0 %v2263_v37  ;;  %1169 = vmatpush1.bf16.msra.mxu1 %v2276_v39 }
 0x435   :  { %1129 = vmatprep.subr.bf16.mxu0 %v2270_v38  ;;  %1170 = vmatprep.subr.bf16.mxu1 %v2283_v40 }
 0x438   :  { %1130 = vmatpush1.bf16.msra.mxu0 %v2290_v41  ;;  %1171 = vmatpush1.bf16.msra.mxu1 %v2297_v42 }
 0x439   :  { %1229 = vmatprep.subr.bf16.mxu0 %v2092_v8  ;;  %1270 = vmatprep.subr.bf16.mxu1 %v2103_v10 }
 0x4ee   :  { %v1035_v12 = vpop.f32.mrb[28].mxu0  ;;  %v1076_v13 = vpop.f32.mrb[28].mxu1 }
 0x4ef   :  { %v1036_v17 = vadd.f32 %v1035_v12, %v997_v9  ;;  %v1077_v18 = vadd.f32 %v1076_v13, %v999_v11  ;;  %v1037_v19 = vpop.f32.mrb[29].mxu0  ;;  %v1078_v20 = vpop.f32.mrb[29].mxu1  ;;  %v2622_v9 = vld [vmem:[%s2864_s3 + $0x48] ss:$16 sps:$4 sm:$0xff]   ;;  %v2628_v11 = vld [vmem:[%s2864_s3 + $0x64] ss:$16 sps:$4 sm:$0xff]  }
 0x4f0   :  { %v1038_v21 = vadd.f32 %v1037_v19, %v998_v14  ;;  %v1079_v22 = vadd.f32 %v1078_v20, %v1000_v16  ;;  %v1039_v47 = vpop.f32.mrb[30].mxu0  ;;  %v1080_v8 = vpop.f32.mrb[30].mxu1  ;;  %v2634_v12 = vld [vmem:[%s2864_s3 + $0x6c] ss:$16 sps:$4 sm:$0xff]  }
 0x4f1   :  { %v1733_v2 = vmul.f32 -1.442695, %v1036_v17  ;;  %v1040_v10 = vpop.f32.mrb[31].mxu0  ;;  %v1081_v33 = vpop.f32.mrb[31].mxu1 }
 0x4f2   :  { %v1734_v57 = vmul.f32 -1.442695, %v1038_v21  ;;  %v1735_v52 = vmul.f32 -1.442695, %v1079_v22 }
 0x4f3   :  { %1917 = vpow2.f32 %v1733_v2 }
 0x4f4   :  { %1919 = vpow2.f32 %v1734_v57 }
 0x4f5   :  { %1921 = vpow2.f32 %v1735_v52 }
 0x4f6   :  { %1923 = vtanh.f32 %v1077_v18 }
 0x4fd   :  { %v1918_v56 = vpop.eup %1917 }
 0x4fe   :  { %v1920_v54 = vpop.eup %1919  ;;  %v1086_v53 = vadd.f32 1.0, %v1918_v56 }
 0x4ff   :  { %v1092_v50 = vadd.f32 1.0, %v1920_v54  ;;  %v1922_v24 = vpop.eup %1921 }
 0x500   :  { %1925 = vrcp.f32 %v1086_v53  ;;  %v1924_v51 = vpop.eup %1923  ;;  %v1099_v46 = vadd.f32 1.0, %v1922_v24 }
 0x501   :  { %1927 = vrcp.f32 %v1092_v50 }
 0x502   :  { %1929 = vrcp.f32 %v1099_v46  ;;  %v2716_v46 = vld [vmem:[%s2864_s3 + $0x80] ss:$16 sps:$4 sm:$0xff]  }
 0x50a   :  { %v1926_v60 = vpop.eup %1925 }
 0x50b   :  { %v1928_v15 = vpop.eup %1927  ;;  %v1103_v44 = vmul.f32 %v1926_v60, %v1924_v51  ;;  %v2692_v51 = vld [vmem:[%s2864_s3 + $0x60] ss:$16 sps:$4 sm:$0xff]   ;;  %v2698_v60 = vld [vmem:[%s2864_s3 + $0x68] ss:$16 sps:$4 sm:$0xff]  }
 0x50c   :  { %v1102_v45 = vmul.f32 %v1928_v15, %v2518_v1  ;;  %v1930_v59 = vpop.eup %1929  ;;  %v2592_v1 = vld [vmem:[%s2864_s3 + $0x20] ss:$16 sps:$4 sm:$0xff]   ;;  %v2704_v15 = vld [vmem:[%s2864_s3 + $0x84] ss:$16 sps:$4 sm:$0xff]  }
 0x50e   :  { %v2560_v61 = vadd.f32 %v1103_v44, %v1102_v45  ;;  %v2710_v44 = vld [vmem:[%s2864_s3 + $0x8c] ss:$16 sps:$4 sm:$0xff]   ;;  %v2722_v45 = vld [vmem:[%s2864_s3 + $0x88] ss:$16 sps:$4 sm:$0xff]  }
 0x510   :  { %1931 = vtanh.f32 %v2560_v61 }
 0x51a   :  { %v1932_v49 = vpop.eup %1931 }
 0x51b   :  { %v1106_v3 = vmul.f32 %v1932_v49, %v1930_v59  ;;  %v2734_v59 = vld [vmem:[%s2864_s3 + $0xac] ss:$16 sps:$4 sm:$0xff]   ;;  %v2740_v49 = vld [vmem:[%s2864_s3 + $0xa0] ss:$16 sps:$4 sm:$0xff]  }
 0x51d   :  { %v1107_v63 = vpack.c.bf16 %v1106_v3, %v1106_v3  ;;  %v2746_v3 = vld [vmem:[%s2864_s3 + $0xa8] ss:$16 sps:$4 sm:$0xff]  }
 0x51f   :  { %1148 = vmatmul.mubr.bf16.vlgmr.msra.gmra.mrb[32].mxu0 %v1107_v63  ;;  %1189 = vmatmul.mubr.bf16.vlgmr.msra.gmra.mrb[32].mxu1 %v1107_v63  ;;  %v2752_v63 = vld [vmem:[%s2864_s3 + $0xc4] ss:$16 sps:$4 sm:$0xff]  }
 0x520   :  { %1230 = vmatpush1.bf16.msra.mxu0 %v2566_v55  ;;  %1271 = vmatpush1.bf16.msra.mxu1 %v2572_v4 }
 0x521   :  { %1231 = vmatprep.subr.bf16.mxu0 %v2578_v7  ;;  %1272 = vmatprep.subr.bf16.mxu1 %v2584_v62 }
 0x522   :  { %1261 = vmatprep.mubr.bf16.mxu0 %v2881_v58  ;;  %1302 = vmatprep.mubr.bf16.mxu1 %v2881_v58 }
 0x524   :  { %1232 = vmatpush1.bf16.msra.mxu0 %v2592_v1  ;;  %1273 = vmatpush1.bf16.msra.mxu1 %v2598_v48 }
 0x525   :  { %1233 = vmatprep.subr.bf16.mxu0 %v2604_v5  ;;  %1274 = vmatprep.subr.bf16.mxu1 %v2610_v43 }
 0x528   :  { %1234 = vmatpush1.bf16.msra.mxu0 %v2616_v6  ;;  %1275 = vmatpush1.bf16.msra.mxu1 %v2622_v9 }
 0x529   :  { %1235 = vmatprep.subr.bf16.mxu0 %v2628_v11  ;;  %1276 = vmatprep.subr.bf16.mxu1 %v2634_v12 }
 0x52c   :  { %1236 = vmatpush1.bf16.msra.mxu0 %v2181_v23  ;;  %1277 = vmatpush1.bf16.msra.mxu1 %v2189_v25  ;;  %v2658_v23 = vld [vmem:[%s2864_s3 + $0x4] ss:$16 sps:$4 sm:$0xff]   ;;  %v2664_v25 = vld [vmem:[%s2864_s3 + $0xc] ss:$16 sps:$4 sm:$0xff]  }
 0x52d   :  { %1237 = vmatprep.subr.bf16.mxu0 %v2197_v26  ;;  %1278 = vmatprep.subr.bf16.mxu1 %v2208_v28  ;;  %v2882_v26 = vld [vmem:[#allocation4_spill] sm:$0xff]  ;;  %v2883_v28 = vld [vmem:[#allocation3_spill] sm:$0xff] }
 0x530   :  { %1238 = vmatpush1.bf16.msra.mxu0 %v2203_v27  ;;  %1279 = vmatpush1.bf16.msra.mxu1 %v2222_v30  ;;  %v1111_v27 = vunpack.c.l.bf16 %v2882_v26 }
 0x531   :  { %1239 = vmatprep.subr.bf16.mxu0 %v2214_v29  ;;  %1280 = vmatprep.subr.bf16.mxu1 %v2229_v31  ;;  %v1113_v29 = vunpack.c.l.bf16 %v2883_v28 }
 0x534   :  { %1240 = vmatpush1.bf16.msra.mxu0 %v2235_v32  ;;  %1281 = vmatpush1.bf16.msra.mxu1 %v2250_v35  ;;  %v1112_v32 = vunpack.c.h.bf16 %v2882_v26  ;;  %v2758_v26 = vld [vmem:[%s2864_s3 + $0xcc] ss:$16 sps:$4 sm:$0xff]  }
 0x535   :  { %1241 = vmatprep.subr.bf16.mxu0 %v2244_v34  ;;  %1282 = vmatprep.subr.bf16.mxu1 %v2256_v36  ;;  %v1114_v34 = vunpack.c.h.bf16 %v2883_v28  ;;  %v2770_v28 = vld [vmem:[%s2864_s3 + $0xc8] ss:$16 sps:$4 sm:$0xff]  }
 0x538   :  { %1242 = vmatpush1.bf16.msra.mxu0 %v2263_v37  ;;  %1283 = vmatpush1.bf16.msra.mxu1 %v2276_v39 }
 0x539   :  { %1243 = vmatprep.subr.bf16.mxu0 %v2270_v38  ;;  %1284 = vmatprep.subr.bf16.mxu1 %v2283_v40 }
 0x53c   :  { %1244 = vmatpush1.bf16.msra.mxu0 %v2290_v41  ;;  %1285 = vmatpush1.bf16.msra.mxu1 %v2297_v42 }
 0x53d   :  { %1343 = vmatprep.subr.bf16.mxu0 %v2658_v23  ;;  %1384 = vmatprep.subr.bf16.mxu1 %v2664_v25 }
 0x5f2   :  { %v1149_v30 = vpop.f32.mrb[32].mxu0  ;;  %v1190_v31 = vpop.f32.mrb[32].mxu1 }
 0x5f3   :  { %v1150_v35 = vadd.f32 %v1149_v30, %v1111_v27  ;;  %v1191_v36 = vadd.f32 %v1190_v31, %v1113_v29  ;;  %v1151_v37 = vpop.f32.mrb[33].mxu0  ;;  %v1192_v38 = vpop.f32.mrb[33].mxu1  ;;  %v2764_v27 = vld [vmem:[%s2864_s3 + $0xc0] ss:$16 sps:$4 sm:$0xff]   ;;  %v2776_v29 = vld [vmem:[%s2864_s3 + $0xe4] ss:$16 sps:$4 sm:$0xff]  }
 0x5f4   :  { %v1152_v39 = vadd.f32 %v1151_v37, %v1112_v32  ;;  %v1193_v40 = vadd.f32 %v1192_v38, %v1114_v34  ;;  %v1153_v41 = vpop.f32.mrb[34].mxu0  ;;  %v1194_v42 = vpop.f32.mrb[34].mxu1  ;;  %v2782_v30 = vld [vmem:[%s2864_s3 + $0xec] ss:$16 sps:$4 sm:$0xff]   ;;  %v2788_v31 = vld [vmem:[%s2864_s3 + $0xe0] ss:$16 sps:$4 sm:$0xff]   ;;  %v1225_v34 = vunpack.c.l.bf16 %v2420_v0 }
 0x5f5   :  { %v1736_v13 = vmul.f32 -1.442695, %v1150_v35  ;;  %v1154_v14 = vpop.f32.mrb[35].mxu0  ;;  %v1195_v16 = vpop.f32.mrb[35].mxu1  ;;  %v2794_v32 = vld [vmem:[%s2864_s3 + $0xe8] ss:$16 sps:$4 sm:$0xff]  }
 0x5f6   :  { %v1737_v17 = vmul.f32 -1.442695, %v1152_v39  ;;  %v1738_v18 = vmul.f32 -1.442695, %v1193_v40  ;;  %v2884_v35 = vld [vmem:[#allocation5_spill] sm:$0xff]  ;;  %v1226_v39 = vunpack.c.h.bf16 %v2420_v0 }
 0x5f7   :  { %1933 = vpow2.f32 %v1736_v13  ;;  %v1228_v40 = vunpack.c.h.bf16 %v2884_v35 }
 0x5f8   :  { %1935 = vpow2.f32 %v1737_v17 }
 0x5f9   :  { %1937 = vpow2.f32 %v1738_v18 }
 0x5fa   :  { %1939 = vtanh.f32 %v1191_v36  ;;  %v1227_v36 = vunpack.c.l.bf16 %v2884_v35 }
 0x601   :  { %v1934_v19 = vpop.eup %1933 }
 0x602   :  { %v1936_v20 = vpop.eup %1935  ;;  %v1200_v21 = vadd.f32 1.0, %v1934_v19 }
 0x603   :  { %v1206_v22 = vadd.f32 1.0, %v1936_v20  ;;  %v1938_v47 = vpop.eup %1937 }
 0x604   :  { %1941 = vrcp.f32 %v1200_v21  ;;  %v1940_v8 = vpop.eup %1939  ;;  %v1213_v57 = vadd.f32 1.0, %v1938_v47 }
 0x605   :  { %1943 = vrcp.f32 %v1206_v22 }
 0x606   :  { %1945 = vrcp.f32 %v1213_v57 }
 0x60e   :  { %v1942_v2 = vpop.eup %1941 }
 0x60f   :  { %v1944_v10 = vpop.eup %1943  ;;  %v1217_v33 = vmul.f32 %v1942_v2, %v1940_v8 }
 0x610   :  { %v1216_v52 = vmul.f32 %v1944_v10, %v2560_v61  ;;  %v1946_v54 = vpop.eup %1945  ;;  %v2728_v61 = vld [vmem:[%s2864_s3 + $0xa4] ss:$16 sps:$4 sm:$0xff]  }
 0x612   :  { %v2672_v56 = vadd.f32 %v1217_v33, %v1216_v52 }
 0x614   :  { %1947 = vtanh.f32 %v2672_v56 }
 0x61e   :  { %v1948_v53 = vpop.eup %1947 }
 0x61f   :  { %v1220_v50 = vmul.f32 %v1948_v53, %v1946_v54 }
 0x621   :  { %v1221_v24 = vpack.c.bf16 %v1220_v50, %v1220_v50 }
 0x623   :  { %1262 = vmatmul.mubr.bf16.vlgmr.msra.gmra.mrb[36].mxu0 %v1221_v24  ;;  %1303 = vmatmul.mubr.bf16.vlgmr.msra.gmra.mrb[36].mxu1 %v1221_v24 }
 0x624   :  { %1344 = vmatpush1.bf16.msra.mxu0 %v2566_v55  ;;  %1385 = vmatpush1.bf16.msra.mxu1 %v2572_v4 }
 0x625   :  { %1345 = vmatprep.subr.bf16.mxu0 %v2578_v7  ;;  %1386 = vmatprep.subr.bf16.mxu1 %v2584_v62 }
 0x626   :  { %1375 = vmatprep.mubr.bf16.mxu0 %v2881_v58  ;;  %1416 = vmatprep.mubr.bf16.mxu1 %v2881_v58 }
 0x628   :  { %1346 = vmatpush1.bf16.msra.mxu0 %v2592_v1  ;;  %1387 = vmatpush1.bf16.msra.mxu1 %v2598_v48 }
 0x629   :  { %1347 = vmatprep.subr.bf16.mxu0 %v2604_v5  ;;  %1388 = vmatprep.subr.bf16.mxu1 %v2610_v43 }
 0x62c   :  { %1348 = vmatpush1.bf16.msra.mxu0 %v2616_v6  ;;  %1389 = vmatpush1.bf16.msra.mxu1 %v2622_v9 }
 0x62d   :  { %1349 = vmatprep.subr.bf16.mxu0 %v2628_v11  ;;  %1390 = vmatprep.subr.bf16.mxu1 %v2634_v12 }
 0x630   :  { %1350 = vmatpush1.bf16.msra.mxu0 %v2692_v51  ;;  %1391 = vmatpush1.bf16.msra.mxu1 %v2698_v60 }
 0x631   :  { %1351 = vmatprep.subr.bf16.mxu0 %v2704_v15  ;;  %1392 = vmatprep.subr.bf16.mxu1 %v2710_v44 }
 0x634   :  { %1352 = vmatpush1.bf16.msra.mxu0 %v2716_v46  ;;  %1393 = vmatpush1.bf16.msra.mxu1 %v2722_v45 }
 0x635   :  { %1353 = vmatprep.subr.bf16.mxu0 %v2728_v61  ;;  %1394 = vmatprep.subr.bf16.mxu1 %v2734_v59 }
 0x638   :  { %1354 = vmatpush1.bf16.msra.mxu0 %v2740_v49  ;;  %1395 = vmatpush1.bf16.msra.mxu1 %v2746_v3 }
 0x639   :  { %1355 = vmatprep.subr.bf16.mxu0 %v2752_v63  ;;  %1396 = vmatprep.subr.bf16.mxu1 %v2758_v26 }
 0x63c   :  { %1356 = vmatpush1.bf16.msra.mxu0 %v2764_v27  ;;  %1397 = vmatpush1.bf16.msra.mxu1 %v2770_v28 }
 0x63d   :  { %1357 = vmatprep.subr.bf16.mxu0 %v2776_v29  ;;  %1398 = vmatprep.subr.bf16.mxu1 %v2782_v30 }
 0x640   :  { %1358 = vmatpush1.bf16.msra.mxu0 %v2788_v31  ;;  %1399 = vmatpush1.bf16.msra.mxu1 %v2794_v32 }
 0x641   :  { %1450 = vmatprep.subr.bf16.mxu0 %v2658_v23  ;;  %1491 = vmatprep.subr.bf16.mxu1 %v2664_v25 }
 0x6f6   :  { %v1263_v37 = vpop.f32.mrb[36].mxu0  ;;  %v1304_v38 = vpop.f32.mrb[36].mxu1 }
 0x6f7   :  { %v1264_v41 = vadd.f32 %v1263_v37, %v1225_v34  ;;  %v1305_v42 = vadd.f32 %v1304_v38, %v1227_v36  ;;  %v1265_v13 = vpop.f32.mrb[37].mxu0  ;;  %v1306_v14 = vpop.f32.mrb[37].mxu1 }
 0x6f8   :  { %v1266_v16 = vadd.f32 %v1265_v13, %v1226_v39  ;;  %v1307_v17 = vadd.f32 %v1306_v14, %v1228_v40  ;;  %v1267_v18 = vpop.f32.mrb[38].mxu0  ;;  %v1308_v23 = vpop.f32.mrb[38].mxu1  ;;  %v2030_v13 = vmov 0.0   ;;  %v1849_v14 = vld [vmem:[%s2866_s4] sm:$0xff]  }
 0x6f9   :  { %v1739_v19 = vmul.f32 -1.442695, %v1264_v41  ;;  %v1268_v25 = vpop.f32.mrb[39].mxu0  ;;  %v1309_v20 = vpop.f32.mrb[39].mxu1  ;;  %v1852_v18 = vld [vmem:[%s2866_s4 + $0x18] sm:$0xff]  }
 0x6fa   :  { %v1740_v21 = vmul.f32 -1.442695, %v1266_v16  ;;  %v1741_v22 = vmul.f32 -1.442695, %v1307_v17  ;;  %v1850_v16 = vld [vmem:[%s2866_s4 + $0x8] sm:$0xff]   ;;  %v1851_v17 = vld [vmem:[%s2866_s4 + $0x10] sm:$0xff]  }
 0x6fb   :  { %1949 = vpow2.f32 %v1739_v19  ;;  %s2032_s4 = smov 64  }
 0x6fc   :  { %1951 = vpow2.f32 %v1740_v21 }
 0x6fd   :  { %1953 = vpow2.f32 %v1741_v22 }
 0x6fe   :  { %1955 = vtanh.f32 %v1305_v42 }
 0x705   :  { %v1950_v47 = vpop.eup %1949 }
 0x706   :  { %v1952_v8 = vpop.eup %1951  ;;  %v1314_v0 = vadd.f32 1.0, %v1950_v47 }
 0x707   :  { %v1320_v2 = vadd.f32 1.0, %v1952_v8  ;;  %v1954_v10 = vpop.eup %1953 }
 0x708   :  { %1957 = vrcp.f32 %v1314_v0  ;;  %v1956_v33 = vpop.eup %1955  ;;  %v1327_v53 = vadd.f32 1.0, %v1954_v10 }
 0x709   :  { %1959 = vrcp.f32 %v1320_v2 }
 0x70a   :  { %1961 = vrcp.f32 %v1327_v53 }
 0x712   :  { %v1958_v57 = vpop.eup %1957 }
 0x713   :  { %v1960_v52 = vpop.eup %1959  ;;  %v1331_v54 = vmul.f32 %v1958_v57, %v1956_v33 }
 0x714   :  { %v1330_v50 = vmul.f32 %v1960_v52, %v2672_v56  ;;  %v1962_v34 = vpop.eup %1961 }
 0x716   :  { %v2804_v24 = vadd.f32 %v1331_v54, %v1330_v50 }
 0x718   :  { %1963 = vtanh.f32 %v2804_v24 }
 0x722   :  { %v1964_v35 = vpop.eup %1963 }
 0x723   :  { %v1334_v36 = vmul.f32 %v1964_v35, %v1962_v34 }
 0x725   :  { %v1335_v37 = vpack.c.bf16 %v1334_v36, %v1334_v36 }
 0x727   :  { %1376 = vmatmul.mubr.bf16.vlgmr.msra.gmra.mrb[40].mxu0 %v1335_v37  ;;  %1417 = vmatmul.mubr.bf16.vlgmr.msra.gmra.mrb[40].mxu1 %v1335_v37 }
 0x728   :  { %1451 = vmatpush1.bf16.msra.mxu0 %v2566_v55  ;;  %1492 = vmatpush1.bf16.msra.mxu1 %v2572_v4 }
 0x729   :  { %1452 = vmatprep.subr.bf16.mxu0 %v2578_v7  ;;  %1493 = vmatprep.subr.bf16.mxu1 %v2584_v62 }
 0x72a   :  { %1482 = vmatprep.mubr.bf16.mxu0 %v2881_v58  ;;  %1523 = vmatprep.mubr.bf16.mxu1 %v2881_v58  ;;  %v2885_v58 = vld [vmem:[#allocation7_spill] sm:$0xff] }
 0x72b   :  { %v1339_v55 = vunpack.c.l.bf16 %v2885_v58  ;;  %v1340_v62 = vunpack.c.h.bf16 %v2885_v58 }
 0x72c   :  { %1453 = vmatpush1.bf16.msra.mxu0 %v2592_v1  ;;  %1494 = vmatpush1.bf16.msra.mxu1 %v2598_v48 }
 0x72d   :  { %1454 = vmatprep.subr.bf16.mxu0 %v2604_v5  ;;  %1495 = vmatprep.subr.bf16.mxu1 %v2610_v43 }
 0x730   :  { %1455 = vmatpush1.bf16.msra.mxu0 %v2616_v6  ;;  %1496 = vmatpush1.bf16.msra.mxu1 %v2622_v9 }
 0x731   :  { %1456 = vmatprep.subr.bf16.mxu0 %v2628_v11  ;;  %1497 = vmatprep.subr.bf16.mxu1 %v2634_v12 }
 0x734   :  { %1457 = vmatpush1.bf16.msra.mxu0 %v2692_v51  ;;  %1498 = vmatpush1.bf16.msra.mxu1 %v2698_v60  ;;  %v2886_v60 = vld [vmem:[#allocation6_spill] sm:$0xff] }
 0x735   :  { %1458 = vmatprep.subr.bf16.mxu0 %v2704_v15  ;;  %1499 = vmatprep.subr.bf16.mxu1 %v2710_v44  ;;  %v1342_v15 = vunpack.c.h.bf16 %v2886_v60 }
 0x738   :  { %1459 = vmatpush1.bf16.msra.mxu0 %v2716_v46  ;;  %1500 = vmatpush1.bf16.msra.mxu1 %v2722_v45  ;;  %v1341_v46 = vunpack.c.l.bf16 %v2886_v60 }
 0x739   :  { %1460 = vmatprep.subr.bf16.mxu0 %v2728_v61  ;;  %1501 = vmatprep.subr.bf16.mxu1 %v2734_v59 }
 0x73c   :  { %1461 = vmatpush1.bf16.msra.mxu0 %v2740_v49  ;;  %1502 = vmatpush1.bf16.msra.mxu1 %v2746_v3 }
 0x73d   :  { %1462 = vmatprep.subr.bf16.mxu0 %v2752_v63  ;;  %1503 = vmatprep.subr.bf16.mxu1 %v2758_v26 }
 0x740   :  { %1463 = vmatpush1.bf16.msra.mxu0 %v2764_v27  ;;  %1504 = vmatpush1.bf16.msra.mxu1 %v2770_v28 }
 0x741   :  { %1464 = vmatprep.subr.bf16.mxu0 %v2776_v29  ;;  %1505 = vmatprep.subr.bf16.mxu1 %v2782_v30 }
 0x744   :  { %1465 = vmatpush1.bf16.msra.mxu0 %v2788_v31  ;;  %1506 = vmatpush1.bf16.msra.mxu1 %v2794_v32 }
 0x745   :  { %1775 = vmatprep.subr.bf16.mxu0 %v2030_v13 }
 0x7fa   :  { %v1377_v4 = vpop.f32.mrb[40].mxu0  ;;  %v1418_v7 = vpop.f32.mrb[40].mxu1 }
 0x7fb   :  { %v1378_v1 = vadd.f32 %v1377_v4, %v1339_v55  ;;  %v1379_v48 = vpop.f32.mrb[41].mxu0  ;;  %v1420_v5 = vpop.f32.mrb[41].mxu1  ;;  %v1419_v61 = vadd.f32 %v1418_v7, %v1341_v46 }
 0x7fc   :  { %v1380_v43 = vadd.f32 %v1379_v48, %v1340_v62  ;;  %v1381_v6 = vpop.f32.mrb[42].mxu0  ;;  %v1422_v9 = vpop.f32.mrb[42].mxu1  ;;  %v1421_v44 = vadd.f32 %v1420_v5, %v1342_v15 }
 0x7fd   :  { %v1742_v11 = vmul.f32 -1.442695, %v1378_v1  ;;  %v1382_v12 = vpop.f32.mrb[43].mxu0  ;;  %v1423_v56 = vpop.f32.mrb[43].mxu1  ;;  %v1748_v9 = vld [vmem:[%s2867_s5] ss:$0 sm:$0xff] }
 0x7fe   :  { %v1743_v51 = vmul.f32 -1.442695, %v1380_v43  ;;  %v1744_v45 = vmul.f32 -1.442695, %v1421_v44 }
 0x7ff   :  { %1965 = vpow2.f32 %v1742_v11 }
 0x800   :  { %1967 = vpow2.f32 %v1743_v51 }
 0x801   :  { %1969 = vpow2.f32 %v1744_v45 }
 0x802   :  { %1971 = vtanh.f32 %v1419_v61 }
 0x809   :  { %v1966_v59 = vpop.eup %1965 }
 0x80a   :  { %v1968_v49 = vpop.eup %1967  ;;  %v1428_v3 = vadd.f32 1.0, %v1966_v59 }
 0x80b   :  { %v1434_v63 = vadd.f32 1.0, %v1968_v49  ;;  %v1970_v26 = vpop.eup %1969 }
 0x80c   :  { %1973 = vrcp.f32 %v1428_v3  ;;  %v1972_v27 = vpop.eup %1971  ;;  %v1441_v31 = vadd.f32 1.0, %v1970_v26 }
 0x80d   :  { %1975 = vrcp.f32 %v1434_v63 }
 0x80e   :  { %1977 = vrcp.f32 %v1441_v31 }
 0x816   :  { %v1974_v28 = vpop.eup %1973 }
 0x817   :  { %v1976_v29 = vpop.eup %1975  ;;  %v1445_v30 = vmul.f32 %v1974_v28, %v1972_v27 }
 0x818   :  { %v1444_v32 = vmul.f32 %v1976_v29, %v2804_v24  ;;  %v1978_v39 = vpop.eup %1977 }
 0x81a   :  { %v1446_v38 = vadd.f32 %v1445_v30, %v1444_v32 }
 0x81c   :  { %1979 = vtanh.f32 %v1446_v38 }
 0x826   :  { %v1980_v40 = vpop.eup %1979 }
 0x827   :  { %v1448_v41 = vmul.f32 %v1980_v40, %v1978_v39 }
 0x829   :  { %v1449_v42 = vpack.c.bf16 %v1448_v41, %v1448_v41 }
 0x82b   :  { %1483 = vmatmul.mubr.bf16.vlgmr.msra.gmra.mrb[44].mxu0 %v1449_v42  ;;  %1524 = vmatmul.mubr.bf16.vlgmr.msra.gmra.mrb[44].mxu1 %v1449_v42 }
 0x82c   :  { %1776 = vmatpush3.bf16.msra.mxu0 %v1849_v14  ;;  %1783 = vmatprep.mubr.msk.bf16.mxu0 %vm2031_vm4, %v2030_v13 }
 0x82d   :  { %1777 = vmatprep.subr.bf16.mxu0 %v2030_v13 }
 0x830   :  { %1778 = vmatpush3.bf16.msra.mxu0 %v1850_v16 }
 0x831   :  { %1779 = vmatprep.subr.bf16.mxu0 %v2030_v13 }
 0x834   :  { %1780 = vmatpush3.bf16.msra.mxu0 %v1851_v17 }
 0x835   :  { %1781 = vmatprep.subr.bf16.mxu0 %v2030_v13 }
 0x838   :  { %1782 = vmatpush3.bf16.msra.mxu0 %v1852_v18 }
 0x8fe   :  { %v1484_v23 = vpop.f32.mrb[44].mxu0  ;;  %v1525_v19 = vpop.f32.mrb[44].mxu1 }
 0x8ff   :  { %v1485_v25 = vadd.f32 %v1484_v23, %v1339_v55  ;;  %v1486_v20 = vpop.f32.mrb[45].mxu0  ;;  %v1527_v21 = vpop.f32.mrb[45].mxu1  ;;  %v1526_v54 = vadd.f32 %v1525_v19, %v1341_v46 }
 0x900   :  { %v1487_v22 = vadd.f32 %v1486_v20, %v1340_v62  ;;  %v1488_v47 = vpop.f32.mrb[46].mxu0  ;;  %v1529_v8 = vpop.f32.mrb[46].mxu1  ;;  %v1528_v57 = vadd.f32 %v1527_v21, %v1342_v15 }
 0x901   :  { %v1745_v0 = vmul.f32 -1.442695, %v1485_v25  ;;  %v1489_v2 = vpop.f32.mrb[47].mxu0  ;;  %v1530_v10 = vpop.f32.mrb[47].mxu1 }
 0x902   :  { %v1746_v33 = vmul.f32 -1.442695, %v1487_v22  ;;  %v1747_v52 = vmul.f32 -1.442695, %v1528_v57 }
 0x903   :  { %1981 = vpow2.f32 %v1745_v0 }
 0x904   :  { %1983 = vpow2.f32 %v1746_v33 }
 0x905   :  { %1985 = vpow2.f32 %v1747_v52 }
 0x906   :  { %1987 = vtanh.f32 %v1526_v54 }
 0x90d   :  { %v1982_v53 = vpop.eup %1981 }
 0x90e   :  { %v1984_v50 = vpop.eup %1983  ;;  %v1535_v24 = vadd.f32 1.0, %v1982_v53 }
 0x90f   :  { %v1541_v34 = vadd.f32 1.0, %v1984_v50  ;;  %v1986_v35 = vpop.eup %1985 }
 0x910   :  { %1989 = vrcp.f32 %v1535_v24  ;;  %v1988_v36 = vpop.eup %1987  ;;  %v1548_v4 = vadd.f32 1.0, %v1986_v35 }
 0x911   :  { %1991 = vrcp.f32 %v1541_v34 }
 0x912   :  { %1993 = vrcp.f32 %v1548_v4 }
 0x91a   :  { %v1990_v37 = vpop.eup %1989 }
 0x91b   :  { %v1992_v58 = vpop.eup %1991  ;;  %v1552_v55 = vmul.f32 %v1990_v37, %v1988_v36 }
 0x91c   :  { %v1551_v7 = vmul.f32 %v1992_v58, %v1446_v38  ;;  %v1994_v1 = vpop.eup %1993 }
 0x91e   :  { %v1553_v62 = vadd.f32 %v1552_v55, %v1551_v7 }
 0x920   :  { %1995 = vtanh.f32 %v1553_v62 }
 0x92a   :  { %v1996_v48 = vpop.eup %1995 }
 0x92b   :  { %v1555_v5 = vmul.f32 %v1996_v48, %v1994_v1 }
 0x92d   :  { %v1556_v43 = vpack.c.bf16 %v1555_v5, %v1555_v5 }
 0x92f   :  { %1573 = vrot.lane.b32.xlu0 %v1556_v43, %s2032_s4 }
 0x9a1   :  { %v1574_v6 = vpop.permute.xlu0 %1573 }
 0x9a2   :  { %1784 = vmatmul.mubr.msk.bf16.vlgmr.msra.gmra.mrb[48].mxu0 %vm1599_vm5, %v1574_v6 }
 0xa75   :  { %v1637_v11 = vpop.f32.mrb[48].mxu0 }
 0xa76   :  { %v1638_v12 = vadd.f32 %v1748_v9, %v1637_v11  ;;  %v1785_v56 = vpop.f32.mrb[49].mxu0 }
 0xa77   :  { %v1640_v51 = vpop.f32.mrb[50].mxu0 }
 0xa78   :  { %1644 = vst.msk [vmem:[%s2868_s6] sm:$0xff] %vm1643_vm6, %v1638_v12  ;;  %v1786_v60 = vpop.f32.mrb[51].mxu0 }

</bundles_post_ra>
